<compile_context>
chip_gen: v7x
topology: tpu7x:2x2x1
jax: 0.10.0
libtpu: 0.0.40
codegen_flags: <defaults>
</compile_context>

<pallas_src>
import functools

import jax
import jax.numpy as jnp
from jax import lax
from jax.experimental import pallas as pl
from jax.experimental.pallas import tpu as pltpu


def _round_up(x: int, m: int) -> int:
    return (x + m - 1) // m * m


def _permute_ifgo_to_ifog(a):
    """Permute the last (4H) axis from PyTorch gate order [i,f,g,o] to [i,f,o,g]."""
    i, f, g, o = jnp.split(a, 4, axis=-1)
    return jnp.concatenate([i, f, o, g], axis=-1)


def _make_rnn_kernel(n_layer: int, seq_len: int, hidden_dim: int,
                     batch_tile: int, mm_dtype):
    """Kernel ref order:
         x_ref (T, Bt, D)                              [mm_dtype]
         [w_ih_T (D_l,4H), w_hh_T (H,4H), bias (1,4H)] * n_layer
         w_cls_T (H, NCpad), b_cls (1, NCpad)
         out_ref (Bt, NCpad)
         [seq_scr (T,Bt,H) mm_dtype  -- only if n_layer > 1]
         xproj_scr (T,Bt,4H) f32
    """
    H, T, Bt = hidden_dim, seq_len, batch_tile
    has_seq = n_layer > 1
    unroll = T if T <= 16 else 8

    def kernel(*refs):
        x_ref = refs[0]
        layer_refs = refs[1:1 + 3 * n_layer]
        wc_ref = refs[1 + 3 * n_layer]
        bc_ref = refs[2 + 3 * n_layer]
        out_ref = refs[3 + 3 * n_layer]
        scratch = refs[4 + 3 * n_layer:]
        if has_seq:
            seq_scr, xproj_scr = scratch
        else:
            (xproj_scr,) = scratch
            seq_scr = None

        def run_layer(l, seq_in_2d, write_seq):
            # seq_in_2d: (T*Bt, D_l) in mm_dtype — all timesteps of this layer's input.
            w_ih = layer_refs[3 * l][...]      # (D_l, 4H) mm_dtype
            w_hh = layer_refs[3 * l + 1][...]  # (H,   4H) mm_dtype
            bias = layer_refs[3 * l + 2][...]  # (1,   4H) f32  (= b_ih + b_hh, permuted)

            # Hoisted input projection: one big MXU matmul + single bias broadcast.
            xp = jnp.dot(seq_in_2d, w_ih, preferred_element_type=jnp.float32) + bias
            xproj_scr[...] = xp.reshape(T, Bt, 4 * H)

            def step(t, carry):
                h, c = carry
                gates = xproj_scr[t] + jnp.dot(
                    h.astype(mm_dtype), w_hh, preferred_element_type=jnp.float32)
                # Gate order after wrapper permutation: [i, f, o, g].
                sg = jax.nn.sigmoid(gates[:, :3 * H])      # one contiguous sigmoid slab
                i_g = sg[:, :H]
                f_g = sg[:, H:2 * H]
                o_g = sg[:, 2 * H:3 * H]
                g_g = jnp.tanh(gates[:, 3 * H:])           # one contiguous tanh slab
                c_new = f_g * c + i_g * g_g
                h_new = o_g * jnp.tanh(c_new)
                if write_seq:
                    seq_scr[t] = h_new.astype(seq_scr.dtype)
                return h_new, c_new

            h0 = jnp.zeros((Bt, H), jnp.float32)
            c0 = jnp.zeros((Bt, H), jnp.float32)
            h_last, _ = lax.fori_loop(0, T, step, (h0, c0), unroll=unroll)
            return h_last

        # Layer 0 consumes x; layers > 0 consume the previous layer's sequence scratch.
        in_dim = x_ref.shape[-1]
        seq_in = x_ref[...].reshape(T * Bt, in_dim)          # already mm_dtype
        h_last = run_layer(0, seq_in, has_seq)
        for l in range(1, n_layer):
            seq_in = seq_scr[...].reshape(T * Bt, H)         # already mm_dtype
            h_last = run_layer(l, seq_in, l < n_layer - 1)

        # Classifier on the last timestep of the last layer (lane-dense padded output).
        logits = jnp.dot(h_last.astype(mm_dtype), wc_ref[...],
                         preferred_element_type=jnp.float32) + bc_ref[...]
        out_ref[...] = logits

    return kernel


def rnn_forward(x, params, *, hidden_dim, n_layer, n_class,
                batch_tile=None, matmul_dtype=jnp.bfloat16):
    """LSTM (batch_first) + last-timestep Linear, as a Pallas TPU kernel.

    x: (B, T, in_dim) float32.  Returns (B, n_class) float32.
    """
    B, T, in_dim = x.shape
    H = hidden_dim

    # ---- batch padding / tiling: sublane-dense M, "parallel" grid axis ----
    if batch_tile is None:
        batch_tile = min(128, _round_up(B, 8))
    batch_tile = max(8, _round_up(batch_tile, 8))
    B_pad = _round_up(B, batch_tile)
    n_btiles = B_pad // batch_tile

    # x -> (T, B_pad, in_dim), pre-cast to the matmul dtype (halves streamed bytes
    # on the bf16 path; it is only ever a matmul operand inside the kernel).
    xp = jnp.pad(x.astype(jnp.float32), ((0, B_pad - B), (0, 0), (0, 0)))
    x_tbd = jnp.transpose(xp, (1, 0, 2)).astype(matmul_dtype)

    def resident_spec(shape):
        return pl.BlockSpec(shape, lambda b: tuple(0 for _ in shape))

    inputs = [x_tbd]
    in_specs = [pl.BlockSpec((T, batch_tile, in_dim), lambda b: (0, b, 0))]

    # ---- LSTM weights: transpose, permute gates [i,f,g,o]->[i,f,o,g], matmul dtype ----
    for l in range(n_layer):
        w_ih, w_hh, b_ih, b_hh = params["layers"][l]
        w_ih_t = _permute_ifgo_to_ifog(w_ih.T).astype(matmul_dtype)              # (D_l, 4H)
        w_hh_t = _permute_ifgo_to_ifog(w_hh.T).astype(matmul_dtype)              # (H, 4H)
        bias = _permute_ifgo_to_ifog(b_ih + b_hh)[None, :].astype(jnp.float32)   # (1, 4H)
        inputs += [w_ih_t, w_hh_t, bias]
        in_specs += [resident_spec(w_ih_t.shape),
                     resident_spec(w_hh_t.shape),
                     resident_spec(bias.shape)]

    # ---- classifier: pad n_class to a lane-dense multiple of 128 ----
    NC = _round_up(n_class, 128)
    w_cls_t = jnp.zeros((H, NC), matmul_dtype).at[:, :n_class].set(
        params["w_cls"].T.astype(matmul_dtype))
    b_cls = jnp.zeros((1, NC), jnp.float32).at[:, :n_class].set(
        params["b_cls"].astype(jnp.float32)[None, :])
    inputs += [w_cls_t, b_cls]
    in_specs += [resident_spec(w_cls_t.shape), resident_spec(b_cls.shape)]

    out_spec = pl.BlockSpec((batch_tile, NC), lambda b: (b, 0))

    scratch_shapes = []
    if n_layer > 1:
        scratch_shapes.append(pltpu.VMEM((T, batch_tile, H), matmul_dtype))  # h_t sequence
    scratch_shapes.append(pltpu.VMEM((T, batch_tile, 4 * H), jnp.float32))   # hoisted x-proj

    # ---- explicit VMEM budget (v7x: 64 MiB physical, ~32 MiB scoped default) ----
    mm_bytes = jnp.dtype(matmul_dtype).itemsize
    weight_bytes = sum(int(a.size) * a.dtype.itemsize for a in inputs[1:])
    io_tile_bytes = 2 * (T * batch_tile * in_dim * mm_bytes) + 2 * (batch_tile * NC * 4)
    scratch_bytes = (T * batch_tile * H * mm_bytes if n_layer > 1 else 0) \
        + 4 * (T * batch_tile * 4 * H)
    vmem_limit = max(4 << 20,
                     min(int(1.5 * (weight_bytes + io_tile_bytes + scratch_bytes))
                         + (2 << 20), 32 << 20))

    kernel = _make_rnn_kernel(n_layer, T, H, batch_tile, matmul_dtype)

    out = pl.pallas_call(
        kernel,
        out_shape=jax.ShapeDtypeStruct((B_pad, NC), jnp.float32),
        grid_spec=pltpu.PrefetchScalarGridSpec(
            num_scalar_prefetch=0,
            grid=(n_btiles,),
            in_specs=in_specs,
            out_specs=out_spec,
            scratch_shapes=scratch_shapes,
        ),
        compiler_params=pltpu.CompilerParams(
            dimension_semantics=("parallel",),
            vmem_limit_bytes=vmem_limit,
        ),
    )(*inputs)

    return out[:B, :n_class]


def init_params(key, in_dim, hidden_dim, n_layer, n_class):
    """Deterministic init matching PyTorch default shapes (uniform +-1/sqrt(H))."""
    bound = 1.0 / jnp.sqrt(jnp.float32(hidden_dim))
    layers = []
    for l in range(n_layer):
        d_in = in_dim if l == 0 else hidden_dim
        key, k1, k2, k3, k4 = jax.random.split(key, 5)
        w_ih = jax.random.uniform(k1, (4 * hidden_dim, d_in), jnp.float32, -bound, bound)
        w_hh = jax.random.uniform(k2, (4 * hidden_dim, hidden_dim), jnp.float32, -bound, bound)
        b_ih = jax.random.uniform(k3, (4 * hidden_dim,), jnp.float32, -bound, bound)
        b_hh = jax.random.uniform(k4, (4 * hidden_dim,), jnp.float32, -bound, bound)
        layers.append((w_ih, w_hh, b_ih, b_hh))
    key, k5, k6 = jax.random.split(key, 3)
    w_cls = jax.random.uniform(k5, (n_class, hidden_dim), jnp.float32, -bound, bound)
    b_cls = jax.random.uniform(k6, (n_class,), jnp.float32, -bound, bound)
    return {"layers": layers, "w_cls": w_cls, "b_cls": b_cls}


def rnn_forward_ref(x, params, *, hidden_dim, n_layer, n_class):
    """Pure-JAX reference matching PyTorch nn.LSTM semantics (for validation)."""
    B, T, _ = x.shape
    H = hidden_dim
    layer_in = x
    for l in range(n_layer):
        w_ih, w_hh, b_ih, b_hh = params["layers"][l]
        h = jnp.zeros((B, H), jnp.float32)
        c = jnp.zeros((B, H), jnp.float32)
        outs = []
        for t in range(T):
            gates = layer_in[:, t, :] @ w_ih.T + b_ih + h @ w_hh.T + b_hh
            i = jax.nn.sigmoid(gates[:, 0 * H:1 * H])
            f = jax.nn.sigmoid(gates[:, 1 * H:2 * H])
            g = jnp.tanh(gates[:, 2 * H:3 * H])
            o = jax.nn.sigmoid(gates[:, 3 * H:4 * H])
            c = f * c + i * g
            h = o * jnp.tanh(c)
            outs.append(h)
        layer_in = jnp.stack(outs, axis=1)
    return layer_in[:, -1, :] @ params["w_cls"].T + params["b_cls"]


if __name__ == "__main__":
    batch, seq, in_dim = 2, 8, 16
    hidden_dim, n_layer, n_class = 32, 2, 8

    key = jax.random.PRNGKey(0)
    key, kx = jax.random.split(key)
    x = jax.random.normal(kx, (batch, seq, in_dim), jnp.float32)
    params = init_params(key, in_dim, hidden_dim, n_layer, n_class)

    ref = rnn_forward_ref(x, params, hidden_dim=hidden_dim, n_layer=n_layer,
                          n_class=n_class)

    # f32-matmul path: tight semantic check against the reference.
    fwd_f32 = jax.jit(functools.partial(
        rnn_forward, hidden_dim=hidden_dim, n_layer=n_layer, n_class=n_class,
        matmul_dtype=jnp.float32))
    out_f32 = jax.block_until_ready(fwd_f32(x, params))
    assert out_f32.shape == (batch, n_class)
    assert jnp.allclose(out_f32, ref, atol=1e-4, rtol=1e-4), \
        float(jnp.max(jnp.abs(out_f32 - ref)))

    # bf16-matmul path (default fast path on v5e/v6e/v7x): f32 accumulation/elementwise,
    # slightly looser tolerance from bf16 operand rounding.
    fwd_bf16 = jax.jit(functools.partial(
        rnn_forward, hidden_dim=hidden_dim, n_layer=n_layer, n_class=n_class,
        matmul_dtype=jnp.bfloat16))
    out_bf16 = jax.block_until_ready(fwd_bf16(x, params))
    assert out_bf16.shape == (batch, n_class)
    assert jnp.allclose(out_bf16, ref, atol=5e-2, rtol=5e-2), \
        float(jnp.max(jnp.abs(out_bf16 - ref)))

    print("KERNEL_OK")
</pallas_src>

<mosaic_0001>
module attributes {stable_mosaic.version = 11 : i64} {
  func.func @kernel(%arg0: i32, %arg1: memref<8x8x16xf32, #tpu.memory_space<vmem>>, %arg2: memref<16x128xf32, #tpu.memory_space<vmem>>, %arg3: memref<32x128xf32, #tpu.memory_space<vmem>>, %arg4: memref<1x128xf32, #tpu.memory_space<vmem>>, %arg5: memref<32x128xf32, #tpu.memory_space<vmem>>, %arg6: memref<32x128xf32, #tpu.memory_space<vmem>>, %arg7: memref<1x128xf32, #tpu.memory_space<vmem>>, %arg8: memref<32x128xf32, #tpu.memory_space<vmem>>, %arg9: memref<1x128xf32, #tpu.memory_space<vmem>>, %arg10: memref<8x128xf32, #tpu.memory_space<vmem>>, %arg11: memref<8x8x32xf32, #tpu.memory_space<vmem>>, %arg12: memref<8x8x128xf32, #tpu.memory_space<vmem>>) attributes {dimension_semantics = [#tpu.dimension_semantics<parallel>], iteration_bounds = array<i64: 1>, scalar_prefetch = 0 : i64, scratch_operands = 2 : i64, tpu.core_type = #tpu.core_type<tc>, window_params = [{transform_indices = @transform_0, window_bounds = array<i64: 8, 8, 16>}, {pipeline_mode = #tpu.pipeline_mode<synchronous>, transform_indices = @transform_1, window_bounds = array<i64: 16, 128>}, {pipeline_mode = #tpu.pipeline_mode<synchronous>, transform_indices = @transform_2, window_bounds = array<i64: 32, 128>}, {pipeline_mode = #tpu.pipeline_mode<synchronous>, transform_indices = @transform_3, window_bounds = array<i64: 1, 128>}, {pipeline_mode = #tpu.pipeline_mode<synchronous>, transform_indices = @transform_4, window_bounds = array<i64: 32, 128>}, {pipeline_mode = #tpu.pipeline_mode<synchronous>, transform_indices = @transform_5, window_bounds = array<i64: 32, 128>}, {pipeline_mode = #tpu.pipeline_mode<synchronous>, transform_indices = @transform_6, window_bounds = array<i64: 1, 128>}, {pipeline_mode = #tpu.pipeline_mode<synchronous>, transform_indices = @transform_7, window_bounds = array<i64: 32, 128>}, {pipeline_mode = #tpu.pipeline_mode<synchronous>, transform_indices = @transform_8, window_bounds = array<i64: 1, 128>}, {transform_indices = @transform_9, window_bounds = array<i64: 8, 128>}]} {
    %c0 = arith.constant 0 : index
    %c0_0 = arith.constant 0 : index
    %c0_1 = arith.constant 0 : index
    %0 = vector.load %arg1[%c0, %c0_0, %c0_1] : memref<8x8x16xf32, #tpu.memory_space<vmem>>, vector<8x8x16xf32>
    %1 = vector.shape_cast %0 : vector<8x8x16xf32> to vector<64x16xf32>
    %c0_2 = arith.constant 0 : index
    %c0_3 = arith.constant 0 : index
    %2 = vector.load %arg2[%c0_2, %c0_3] : memref<16x128xf32, #tpu.memory_space<vmem>>, vector<16x128xf32>
    %c0_4 = arith.constant 0 : index
    %c0_5 = arith.constant 0 : index
    %3 = vector.load %arg3[%c0_4, %c0_5] : memref<32x128xf32, #tpu.memory_space<vmem>>, vector<32x128xf32>
    %c0_6 = arith.constant 0 : index
    %c0_7 = arith.constant 0 : index
    %4 = vector.load %arg4[%c0_6, %c0_7] : memref<1x128xf32, #tpu.memory_space<vmem>>, vector<1x128xf32>
    %cst = arith.constant dense<0.000000e+00> : vector<64x128xf32>
    %5 = tpu.matmul %1, %2, %cst {dimension_numbers = #tpu.dot_dimension_numbers<[1], [0], [0], [1], [0, 0, 1, 1], [], []>} : vector<64x16xf32>, vector<16x128xf32>, vector<64x128xf32> -> vector<64x128xf32>
    %6 = vector.broadcast %4 : vector<1x128xf32> to vector<64x128xf32>
    %7 = arith.addf %5, %6 : vector<64x128xf32>
    %8 = vector.shape_cast %7 : vector<64x128xf32> to vector<8x8x128xf32>
    %c0_8 = arith.constant 0 : index
    %c0_9 = arith.constant 0 : index
    %c0_10 = arith.constant 0 : index
    %9 = vector.load %arg12[%c0_8, %c0_9, %c0_10] : memref<8x8x128xf32, #tpu.memory_space<vmem>>, vector<8x8x128xf32>
    tpu.vector_store %arg12[%c0_8, %c0_9, %c0_10], %8 {strides = array<i32>} : memref<8x8x128xf32, #tpu.memory_space<vmem>>, vector<8x8x128xf32>,
    %cst_11 = arith.constant 0.000000e+00 : f32
    %10 = vector.broadcast %cst_11 : f32 to vector<8x32xf32>
    %cst_12 = arith.constant 0.000000e+00 : f32
    %11 = vector.broadcast %cst_12 : f32 to vector<8x32xf32>
    %c0_i32 = arith.constant 0 : i32
    %12 = arith.index_cast %c0_i32 : i32 to index
    %c0_13 = arith.constant 0 : index
    %c0_14 = arith.constant 0 : index
    %13 = vector.load %arg12[%12, %c0_13, %c0_14] : memref<8x8x128xf32, #tpu.memory_space<vmem>>, vector<1x8x128xf32>
    %14 = vector.shape_cast %13 : vector<1x8x128xf32> to vector<8x128xf32>
    %cst_15 = arith.constant dense<0.000000e+00> : vector<8x128xf32>
    %15 = tpu.matmul %10, %3, %cst_15 {dimension_numbers = #tpu.dot_dimension_numbers<[1], [0], [0], [1], [0, 0, 1, 1], [], []>} : vector<8x32xf32>, vector<32x128xf32>, vector<8x128xf32> -> vector<8x128xf32>
    %16 = arith.addf %14, %15 : vector<8x128xf32>
    %17 = vector.extract_strided_slice %16 {offsets = [0, 0], sizes = [8, 96], strides = [1, 1]} : vector<8x128xf32> to vector<8x96xf32>
    %18 = arith.negf %17 : vector<8x96xf32>
    %19 = math.exp %18 : vector<8x96xf32>
    %cst_16 = arith.constant 1.000000e+00 : f32
    %20 = vector.broadcast %cst_16 : f32 to vector<8x96xf32>
    %21 = arith.addf %20, %19 : vector<8x96xf32>
    %22 = arith.divf %20, %21 : vector<8x96xf32>
    %23 = vector.extract_strided_slice %22 {offsets = [0, 0], sizes = [8, 32], strides = [1, 1]} : vector<8x96xf32> to vector<8x32xf32>
    %24 = vector.extract_strided_slice %22 {offsets = [0, 32], sizes = [8, 32], strides = [1, 1]} : vector<8x96xf32> to vector<8x32xf32>
    %25 = vector.extract_strided_slice %22 {offsets = [0, 64], sizes = [8, 32], strides = [1, 1]} : vector<8x96xf32> to vector<8x32xf32>
    %26 = vector.extract_strided_slice %16 {offsets = [0, 96], sizes = [8, 32], strides = [1, 1]} : vector<8x128xf32> to vector<8x32xf32>
    %27 = math.tanh %26 : vector<8x32xf32>
    %28 = arith.mulf %24, %11 : vector<8x32xf32>
    %29 = arith.mulf %23, %27 : vector<8x32xf32>
    %30 = arith.addf %28, %29 : vector<8x32xf32>
    %31 = math.tanh %30 : vector<8x32xf32>
    %32 = arith.mulf %25, %31 : vector<8x32xf32>
    %33 = arith.index_cast %c0_i32 : i32 to index
    %c0_17 = arith.constant 0 : index
    %c0_18 = arith.constant 0 : index
    %34 = vector.load %arg11[%33, %c0_17, %c0_18] : memref<8x8x32xf32, #tpu.memory_space<vmem>>, vector<1x8x32xf32>
    %35 = vector.shape_cast %34 : vector<1x8x32xf32> to vector<8x32xf32>
    %36 = vector.shape_cast %32 : vector<8x32xf32> to vector<1x8x32xf32>
    tpu.vector_store %arg11[%33, %c0_17, %c0_18], %36 {strides = array<i32>} : memref<8x8x32xf32, #tpu.memory_space<vmem>>, vector<1x8x32xf32>,
    %c1_i32 = arith.constant 1 : i32
    %37 = arith.index_cast %c1_i32 : i32 to index
    %c0_19 = arith.constant 0 : index
    %c0_20 = arith.constant 0 : index
    %38 = vector.load %arg12[%37, %c0_19, %c0_20] : memref<8x8x128xf32, #tpu.memory_space<vmem>>, vector<1x8x128xf32>
    %39 = vector.shape_cast %38 : vector<1x8x128xf32> to vector<8x128xf32>
    %cst_21 = arith.constant dense<0.000000e+00> : vector<8x128xf32>
    %40 = tpu.matmul %32, %3, %cst_21 {dimension_numbers = #tpu.dot_dimension_numbers<[1], [0], [0], [1], [0, 0, 1, 1], [], []>} : vector<8x32xf32>, vector<32x128xf32>, vector<8x128xf32> -> vector<8x128xf32>
    %41 = arith.addf %39, %40 : vector<8x128xf32>
    %42 = vector.extract_strided_slice %41 {offsets = [0, 0], sizes = [8, 96], strides = [1, 1]} : vector<8x128xf32> to vector<8x96xf32>
    %43 = arith.negf %42 : vector<8x96xf32>
    %44 = math.exp %43 : vector<8x96xf32>
    %cst_22 = arith.constant 1.000000e+00 : f32
    %45 = vector.broadcast %cst_22 : f32 to vector<8x96xf32>
    %46 = arith.addf %45, %44 : vector<8x96xf32>
    %47 = arith.divf %45, %46 : vector<8x96xf32>
    %48 = vector.extract_strided_slice %47 {offsets = [0, 0], sizes = [8, 32], strides = [1, 1]} : vector<8x96xf32> to vector<8x32xf32>
    %49 = vector.extract_strided_slice %47 {offsets = [0, 32], sizes = [8, 32], strides = [1, 1]} : vector<8x96xf32> to vector<8x32xf32>
    %50 = vector.extract_strided_slice %47 {offsets = [0, 64], sizes = [8, 32], strides = [1, 1]} : vector<8x96xf32> to vector<8x32xf32>
    %51 = vector.extract_strided_slice %41 {offsets = [0, 96], sizes = [8, 32], strides = [1, 1]} : vector<8x128xf32> to vector<8x32xf32>
    %52 = math.tanh %51 : vector<8x32xf32>
    %53 = arith.mulf %49, %30 : vector<8x32xf32>
    %54 = arith.mulf %48, %52 : vector<8x32xf32>
    %55 = arith.addf %53, %54 : vector<8x32xf32>
    %56 = math.tanh %55 : vector<8x32xf32>
    %57 = arith.mulf %50, %56 : vector<8x32xf32>
    %58 = arith.index_cast %c1_i32 : i32 to index
    %c0_23 = arith.constant 0 : index
    %c0_24 = arith.constant 0 : index
    %59 = vector.load %arg11[%58, %c0_23, %c0_24] : memref<8x8x32xf32, #tpu.memory_space<vmem>>, vector<1x8x32xf32>
    %60 = vector.shape_cast %59 : vector<1x8x32xf32> to vector<8x32xf32>
    %61 = vector.shape_cast %57 : vector<8x32xf32> to vector<1x8x32xf32>
    tpu.vector_store %arg11[%58, %c0_23, %c0_24], %61 {strides = array<i32>} : memref<8x8x32xf32, #tpu.memory_space<vmem>>, vector<1x8x32xf32>,
    %c2_i32 = arith.constant 2 : i32
    %62 = arith.index_cast %c2_i32 : i32 to index
    %c0_25 = arith.constant 0 : index
    %c0_26 = arith.constant 0 : index
    %63 = vector.load %arg12[%62, %c0_25, %c0_26] : memref<8x8x128xf32, #tpu.memory_space<vmem>>, vector<1x8x128xf32>
    %64 = vector.shape_cast %63 : vector<1x8x128xf32> to vector<8x128xf32>
    %cst_27 = arith.constant dense<0.000000e+00> : vector<8x128xf32>
    %65 = tpu.matmul %57, %3, %cst_27 {dimension_numbers = #tpu.dot_dimension_numbers<[1], [0], [0], [1], [0, 0, 1, 1], [], []>} : vector<8x32xf32>, vector<32x128xf32>, vector<8x128xf32> -> vector<8x128xf32>
    %66 = arith.addf %64, %65 : vector<8x128xf32>
    %67 = vector.extract_strided_slice %66 {offsets = [0, 0], sizes = [8, 96], strides = [1, 1]} : vector<8x128xf32> to vector<8x96xf32>
    %68 = arith.negf %67 : vector<8x96xf32>
    %69 = math.exp %68 : vector<8x96xf32>
    %cst_28 = arith.constant 1.000000e+00 : f32
    %70 = vector.broadcast %cst_28 : f32 to vector<8x96xf32>
    %71 = arith.addf %70, %69 : vector<8x96xf32>
    %72 = arith.divf %70, %71 : vector<8x96xf32>
    %73 = vector.extract_strided_slice %72 {offsets = [0, 0], sizes = [8, 32], strides = [1, 1]} : vector<8x96xf32> to vector<8x32xf32>
    %74 = vector.extract_strided_slice %72 {offsets = [0, 32], sizes = [8, 32], strides = [1, 1]} : vector<8x96xf32> to vector<8x32xf32>
    %75 = vector.extract_strided_slice %72 {offsets = [0, 64], sizes = [8, 32], strides = [1, 1]} : vector<8x96xf32> to vector<8x32xf32>
    %76 = vector.extract_strided_slice %66 {offsets = [0, 96], sizes = [8, 32], strides = [1, 1]} : vector<8x128xf32> to vector<8x32xf32>
    %77 = math.tanh %76 : vector<8x32xf32>
    %78 = arith.mulf %74, %55 : vector<8x32xf32>
    %79 = arith.mulf %73, %77 : vector<8x32xf32>
    %80 = arith.addf %78, %79 : vector<8x32xf32>
    %81 = math.tanh %80 : vector<8x32xf32>
    %82 = arith.mulf %75, %81 : vector<8x32xf32>
    %83 = arith.index_cast %c2_i32 : i32 to index
    %c0_29 = arith.constant 0 : index
    %c0_30 = arith.constant 0 : index
    %84 = vector.load %arg11[%83, %c0_29, %c0_30] : memref<8x8x32xf32, #tpu.memory_space<vmem>>, vector<1x8x32xf32>
    %85 = vector.shape_cast %84 : vector<1x8x32xf32> to vector<8x32xf32>
    %86 = vector.shape_cast %82 : vector<8x32xf32> to vector<1x8x32xf32>
    tpu.vector_store %arg11[%83, %c0_29, %c0_30], %86 {strides = array<i32>} : memref<8x8x32xf32, #tpu.memory_space<vmem>>, vector<1x8x32xf32>,
    %c3_i32 = arith.constant 3 : i32
    %87 = arith.index_cast %c3_i32 : i32 to index
    %c0_31 = arith.constant 0 : index
    %c0_32 = arith.constant 0 : index
    %88 = vector.load %arg12[%87, %c0_31, %c0_32] : memref<8x8x128xf32, #tpu.memory_space<vmem>>, vector<1x8x128xf32>
    %89 = vector.shape_cast %88 : vector<1x8x128xf32> to vector<8x128xf32>
    %cst_33 = arith.constant dense<0.000000e+00> : vector<8x128xf32>
    %90 = tpu.matmul %82, %3, %cst_33 {dimension_numbers = #tpu.dot_dimension_numbers<[1], [0], [0], [1], [0, 0, 1, 1], [], []>} : vector<8x32xf32>, vector<32x128xf32>, vector<8x128xf32> -> vector<8x128xf32>
    %91 = arith.addf %89, %90 : vector<8x128xf32>
    %92 = vector.extract_strided_slice %91 {offsets = [0, 0], sizes = [8, 96], strides = [1, 1]} : vector<8x128xf32> to vector<8x96xf32>
    %93 = arith.negf %92 : vector<8x96xf32>
    %94 = math.exp %93 : vector<8x96xf32>
    %cst_34 = arith.constant 1.000000e+00 : f32
    %95 = vector.broadcast %cst_34 : f32 to vector<8x96xf32>
    %96 = arith.addf %95, %94 : vector<8x96xf32>
    %97 = arith.divf %95, %96 : vector<8x96xf32>
    %98 = vector.extract_strided_slice %97 {offsets = [0, 0], sizes = [8, 32], strides = [1, 1]} : vector<8x96xf32> to vector<8x32xf32>
    %99 = vector.extract_strided_slice %97 {offsets = [0, 32], sizes = [8, 32], strides = [1, 1]} : vector<8x96xf32> to vector<8x32xf32>
    %100 = vector.extract_strided_slice %97 {offsets = [0, 64], sizes = [8, 32], strides = [1, 1]} : vector<8x96xf32> to vector<8x32xf32>
    %101 = vector.extract_strided_slice %91 {offsets = [0, 96], sizes = [8, 32], strides = [1, 1]} : vector<8x128xf32> to vector<8x32xf32>
    %102 = math.tanh %101 : vector<8x32xf32>
    %103 = arith.mulf %99, %80 : vector<8x32xf32>
    %104 = arith.mulf %98, %102 : vector<8x32xf32>
    %105 = arith.addf %103, %104 : vector<8x32xf32>
    %106 = math.tanh %105 : vector<8x32xf32>
    %107 = arith.mulf %100, %106 : vector<8x32xf32>
    %108 = arith.index_cast %c3_i32 : i32 to index
    %c0_35 = arith.constant 0 : index
    %c0_36 = arith.constant 0 : index
    %109 = vector.load %arg11[%108, %c0_35, %c0_36] : memref<8x8x32xf32, #tpu.memory_space<vmem>>, vector<1x8x32xf32>
    %110 = vector.shape_cast %109 : vector<1x8x32xf32> to vector<8x32xf32>
    %111 = vector.shape_cast %107 : vector<8x32xf32> to vector<1x8x32xf32>
    tpu.vector_store %arg11[%108, %c0_35, %c0_36], %111 {strides = array<i32>} : memref<8x8x32xf32, #tpu.memory_space<vmem>>, vector<1x8x32xf32>,
    %c4_i32 = arith.constant 4 : i32
    %112 = arith.index_cast %c4_i32 : i32 to index
    %c0_37 = arith.constant 0 : index
    %c0_38 = arith.constant 0 : index
    %113 = vector.load %arg12[%112, %c0_37, %c0_38] : memref<8x8x128xf32, #tpu.memory_space<vmem>>, vector<1x8x128xf32>
    %114 = vector.shape_cast %113 : vector<1x8x128xf32> to vector<8x128xf32>
    %cst_39 = arith.constant dense<0.000000e+00> : vector<8x128xf32>
    %115 = tpu.matmul %107, %3, %cst_39 {dimension_numbers = #tpu.dot_dimension_numbers<[1], [0], [0], [1], [0, 0, 1, 1], [], []>} : vector<8x32xf32>, vector<32x128xf32>, vector<8x128xf32> -> vector<8x128xf32>
    %116 = arith.addf %114, %115 : vector<8x128xf32>
    %117 = vector.extract_strided_slice %116 {offsets = [0, 0], sizes = [8, 96], strides = [1, 1]} : vector<8x128xf32> to vector<8x96xf32>
    %118 = arith.negf %117 : vector<8x96xf32>
    %119 = math.exp %118 : vector<8x96xf32>
    %cst_40 = arith.constant 1.000000e+00 : f32
    %120 = vector.broadcast %cst_40 : f32 to vector<8x96xf32>
    %121 = arith.addf %120, %119 : vector<8x96xf32>
    %122 = arith.divf %120, %121 : vector<8x96xf32>
    %123 = vector.extract_strided_slice %122 {offsets = [0, 0], sizes = [8, 32], strides = [1, 1]} : vector<8x96xf32> to vector<8x32xf32>
    %124 = vector.extract_strided_slice %122 {offsets = [0, 32], sizes = [8, 32], strides = [1, 1]} : vector<8x96xf32> to vector<8x32xf32>
    %125 = vector.extract_strided_slice %122 {offsets = [0, 64], sizes = [8, 32], strides = [1, 1]} : vector<8x96xf32> to vector<8x32xf32>
    %126 = vector.extract_strided_slice %116 {offsets = [0, 96], sizes = [8, 32], strides = [1, 1]} : vector<8x128xf32> to vector<8x32xf32>
    %127 = math.tanh %126 : vector<8x32xf32>
    %128 = arith.mulf %124, %105 : vector<8x32xf32>
    %129 = arith.mulf %123, %127 : vector<8x32xf32>
    %130 = arith.addf %128, %129 : vector<8x32xf32>
    %131 = math.tanh %130 : vector<8x32xf32>
    %132 = arith.mulf %125, %131 : vector<8x32xf32>
    %133 = arith.index_cast %c4_i32 : i32 to index
    %c0_41 = arith.constant 0 : index
    %c0_42 = arith.constant 0 : index
    %134 = vector.load %arg11[%133, %c0_41, %c0_42] : memref<8x8x32xf32, #tpu.memory_space<vmem>>, vector<1x8x32xf32>
    %135 = vector.shape_cast %134 : vector<1x8x32xf32> to vector<8x32xf32>
    %136 = vector.shape_cast %132 : vector<8x32xf32> to vector<1x8x32xf32>
    tpu.vector_store %arg11[%133, %c0_41, %c0_42], %136 {strides = array<i32>} : memref<8x8x32xf32, #tpu.memory_space<vmem>>, vector<1x8x32xf32>,
    %c5_i32 = arith.constant 5 : i32
    %137 = arith.index_cast %c5_i32 : i32 to index
    %c0_43 = arith.constant 0 : index
    %c0_44 = arith.constant 0 : index
    %138 = vector.load %arg12[%137, %c0_43, %c0_44] : memref<8x8x128xf32, #tpu.memory_space<vmem>>, vector<1x8x128xf32>
    %139 = vector.shape_cast %138 : vector<1x8x128xf32> to vector<8x128xf32>
    %cst_45 = arith.constant dense<0.000000e+00> : vector<8x128xf32>
    %140 = tpu.matmul %132, %3, %cst_45 {dimension_numbers = #tpu.dot_dimension_numbers<[1], [0], [0], [1], [0, 0, 1, 1], [], []>} : vector<8x32xf32>, vector<32x128xf32>, vector<8x128xf32> -> vector<8x128xf32>
    %141 = arith.addf %139, %140 : vector<8x128xf32>
    %142 = vector.extract_strided_slice %141 {offsets = [0, 0], sizes = [8, 96], strides = [1, 1]} : vector<8x128xf32> to vector<8x96xf32>
    %143 = arith.negf %142 : vector<8x96xf32>
    %144 = math.exp %143 : vector<8x96xf32>
    %cst_46 = arith.constant 1.000000e+00 : f32
    %145 = vector.broadcast %cst_46 : f32 to vector<8x96xf32>
    %146 = arith.addf %145, %144 : vector<8x96xf32>
    %147 = arith.divf %145, %146 : vector<8x96xf32>
    %148 = vector.extract_strided_slice %147 {offsets = [0, 0], sizes = [8, 32], strides = [1, 1]} : vector<8x96xf32> to vector<8x32xf32>
    %149 = vector.extract_strided_slice %147 {offsets = [0, 32], sizes = [8, 32], strides = [1, 1]} : vector<8x96xf32> to vector<8x32xf32>
    %150 = vector.extract_strided_slice %147 {offsets = [0, 64], sizes = [8, 32], strides = [1, 1]} : vector<8x96xf32> to vector<8x32xf32>
    %151 = vector.extract_strided_slice %141 {offsets = [0, 96], sizes = [8, 32], strides = [1, 1]} : vector<8x128xf32> to vector<8x32xf32>
    %152 = math.tanh %151 : vector<8x32xf32>
    %153 = arith.mulf %149, %130 : vector<8x32xf32>
    %154 = arith.mulf %148, %152 : vector<8x32xf32>
    %155 = arith.addf %153, %154 : vector<8x32xf32>
    %156 = math.tanh %155 : vector<8x32xf32>
    %157 = arith.mulf %150, %156 : vector<8x32xf32>
    %158 = arith.index_cast %c5_i32 : i32 to index
    %c0_47 = arith.constant 0 : index
    %c0_48 = arith.constant 0 : index
    %159 = vector.load %arg11[%158, %c0_47, %c0_48] : memref<8x8x32xf32, #tpu.memory_space<vmem>>, vector<1x8x32xf32>
    %160 = vector.shape_cast %159 : vector<1x8x32xf32> to vector<8x32xf32>
    %161 = vector.shape_cast %157 : vector<8x32xf32> to vector<1x8x32xf32>
    tpu.vector_store %arg11[%158, %c0_47, %c0_48], %161 {strides = array<i32>} : memref<8x8x32xf32, #tpu.memory_space<vmem>>, vector<1x8x32xf32>,
    %c6_i32 = arith.constant 6 : i32
    %162 = arith.index_cast %c6_i32 : i32 to index
    %c0_49 = arith.constant 0 : index
    %c0_50 = arith.constant 0 : index
    %163 = vector.load %arg12[%162, %c0_49, %c0_50] : memref<8x8x128xf32, #tpu.memory_space<vmem>>, vector<1x8x128xf32>
    %164 = vector.shape_cast %163 : vector<1x8x128xf32> to vector<8x128xf32>
    %cst_51 = arith.constant dense<0.000000e+00> : vector<8x128xf32>
    %165 = tpu.matmul %157, %3, %cst_51 {dimension_numbers = #tpu.dot_dimension_numbers<[1], [0], [0], [1], [0, 0, 1, 1], [], []>} : vector<8x32xf32>, vector<32x128xf32>, vector<8x128xf32> -> vector<8x128xf32>
    %166 = arith.addf %164, %165 : vector<8x128xf32>
    %167 = vector.extract_strided_slice %166 {offsets = [0, 0], sizes = [8, 96], strides = [1, 1]} : vector<8x128xf32> to vector<8x96xf32>
    %168 = arith.negf %167 : vector<8x96xf32>
    %169 = math.exp %168 : vector<8x96xf32>
    %cst_52 = arith.constant 1.000000e+00 : f32
    %170 = vector.broadcast %cst_52 : f32 to vector<8x96xf32>
    %171 = arith.addf %170, %169 : vector<8x96xf32>
    %172 = arith.divf %170, %171 : vector<8x96xf32>
    %173 = vector.extract_strided_slice %172 {offsets = [0, 0], sizes = [8, 32], strides = [1, 1]} : vector<8x96xf32> to vector<8x32xf32>
    %174 = vector.extract_strided_slice %172 {offsets = [0, 32], sizes = [8, 32], strides = [1, 1]} : vector<8x96xf32> to vector<8x32xf32>
    %175 = vector.extract_strided_slice %172 {offsets = [0, 64], sizes = [8, 32], strides = [1, 1]} : vector<8x96xf32> to vector<8x32xf32>
    %176 = vector.extract_strided_slice %166 {offsets = [0, 96], sizes = [8, 32], strides = [1, 1]} : vector<8x128xf32> to vector<8x32xf32>
    %177 = math.tanh %176 : vector<8x32xf32>
    %178 = arith.mulf %174, %155 : vector<8x32xf32>
    %179 = arith.mulf %173, %177 : vector<8x32xf32>
    %180 = arith.addf %178, %179 : vector<8x32xf32>
    %181 = math.tanh %180 : vector<8x32xf32>
    %182 = arith.mulf %175, %181 : vector<8x32xf32>
    %183 = arith.index_cast %c6_i32 : i32 to index
    %c0_53 = arith.constant 0 : index
    %c0_54 = arith.constant 0 : index
    %184 = vector.load %arg11[%183, %c0_53, %c0_54] : memref<8x8x32xf32, #tpu.memory_space<vmem>>, vector<1x8x32xf32>
    %185 = vector.shape_cast %184 : vector<1x8x32xf32> to vector<8x32xf32>
    %186 = vector.shape_cast %182 : vector<8x32xf32> to vector<1x8x32xf32>
    tpu.vector_store %arg11[%183, %c0_53, %c0_54], %186 {strides = array<i32>} : memref<8x8x32xf32, #tpu.memory_space<vmem>>, vector<1x8x32xf32>,
    %c7_i32 = arith.constant 7 : i32
    %187 = arith.index_cast %c7_i32 : i32 to index
    %c0_55 = arith.constant 0 : index
    %c0_56 = arith.constant 0 : index
    %188 = vector.load %arg12[%187, %c0_55, %c0_56] : memref<8x8x128xf32, #tpu.memory_space<vmem>>, vector<1x8x128xf32>
    %189 = vector.shape_cast %188 : vector<1x8x128xf32> to vector<8x128xf32>
    %cst_57 = arith.constant dense<0.000000e+00> : vector<8x128xf32>
    %190 = tpu.matmul %182, %3, %cst_57 {dimension_numbers = #tpu.dot_dimension_numbers<[1], [0], [0], [1], [0, 0, 1, 1], [], []>} : vector<8x32xf32>, vector<32x128xf32>, vector<8x128xf32> -> vector<8x128xf32>
    %191 = arith.addf %189, %190 : vector<8x128xf32>
    %192 = vector.extract_strided_slice %191 {offsets = [0, 0], sizes = [8, 96], strides = [1, 1]} : vector<8x128xf32> to vector<8x96xf32>
    %193 = arith.negf %192 : vector<8x96xf32>
    %194 = math.exp %193 : vector<8x96xf32>
    %cst_58 = arith.constant 1.000000e+00 : f32
    %195 = vector.broadcast %cst_58 : f32 to vector<8x96xf32>
    %196 = arith.addf %195, %194 : vector<8x96xf32>
    %197 = arith.divf %195, %196 : vector<8x96xf32>
    %198 = vector.extract_strided_slice %197 {offsets = [0, 0], sizes = [8, 32], strides = [1, 1]} : vector<8x96xf32> to vector<8x32xf32>
    %199 = vector.extract_strided_slice %197 {offsets = [0, 32], sizes = [8, 32], strides = [1, 1]} : vector<8x96xf32> to vector<8x32xf32>
    %200 = vector.extract_strided_slice %197 {offsets = [0, 64], sizes = [8, 32], strides = [1, 1]} : vector<8x96xf32> to vector<8x32xf32>
    %201 = vector.extract_strided_slice %191 {offsets = [0, 96], sizes = [8, 32], strides = [1, 1]} : vector<8x128xf32> to vector<8x32xf32>
    %202 = math.tanh %201 : vector<8x32xf32>
    %203 = arith.mulf %199, %180 : vector<8x32xf32>
    %204 = arith.mulf %198, %202 : vector<8x32xf32>
    %205 = arith.addf %203, %204 : vector<8x32xf32>
    %206 = math.tanh %205 : vector<8x32xf32>
    %207 = arith.mulf %200, %206 : vector<8x32xf32>
    %208 = arith.index_cast %c7_i32 : i32 to index
    %c0_59 = arith.constant 0 : index
    %c0_60 = arith.constant 0 : index
    %209 = vector.load %arg11[%208, %c0_59, %c0_60] : memref<8x8x32xf32, #tpu.memory_space<vmem>>, vector<1x8x32xf32>
    %210 = vector.shape_cast %209 : vector<1x8x32xf32> to vector<8x32xf32>
    %211 = vector.shape_cast %207 : vector<8x32xf32> to vector<1x8x32xf32>
    tpu.vector_store %arg11[%208, %c0_59, %c0_60], %211 {strides = array<i32>} : memref<8x8x32xf32, #tpu.memory_space<vmem>>, vector<1x8x32xf32>,
    %c8_i32 = arith.constant 8 : i32
    %c0_61 = arith.constant 0 : index
    %c0_62 = arith.constant 0 : index
    %c0_63 = arith.constant 0 : index
    %212 = vector.load %arg11[%c0_61, %c0_62, %c0_63] : memref<8x8x32xf32, #tpu.memory_space<vmem>>, vector<8x8x32xf32>
    %213 = vector.shape_cast %212 : vector<8x8x32xf32> to vector<64x32xf32>
    %c0_64 = arith.constant 0 : index
    %c0_65 = arith.constant 0 : index
    %214 = vector.load %arg5[%c0_64, %c0_65] : memref<32x128xf32, #tpu.memory_space<vmem>>, vector<32x128xf32>
    %c0_66 = arith.constant 0 : index
    %c0_67 = arith.constant 0 : index
    %215 = vector.load %arg6[%c0_66, %c0_67] : memref<32x128xf32, #tpu.memory_space<vmem>>, vector<32x128xf32>
    %c0_68 = arith.constant 0 : index
    %c0_69 = arith.constant 0 : index
    %216 = vector.load %arg7[%c0_68, %c0_69] : memref<1x128xf32, #tpu.memory_space<vmem>>, vector<1x128xf32>
    %cst_70 = arith.constant dense<0.000000e+00> : vector<64x128xf32>
    %217 = tpu.matmul %213, %214, %cst_70 {dimension_numbers = #tpu.dot_dimension_numbers<[1], [0], [0], [1], [0, 0, 1, 1], [], []>} : vector<64x32xf32>, vector<32x128xf32>, vector<64x128xf32> -> vector<64x128xf32>
    %218 = vector.broadcast %216 : vector<1x128xf32> to vector<64x128xf32>
    %219 = arith.addf %217, %218 : vector<64x128xf32>
    %220 = vector.shape_cast %219 : vector<64x128xf32> to vector<8x8x128xf32>
    %c0_71 = arith.constant 0 : index
    %c0_72 = arith.constant 0 : index
    %c0_73 = arith.constant 0 : index
    %221 = vector.load %arg12[%c0_71, %c0_72, %c0_73] : memref<8x8x128xf32, #tpu.memory_space<vmem>>, vector<8x8x128xf32>
    tpu.vector_store %arg12[%c0_71, %c0_72, %c0_73], %220 {strides = array<i32>} : memref<8x8x128xf32, #tpu.memory_space<vmem>>, vector<8x8x128xf32>,
    %cst_74 = arith.constant 0.000000e+00 : f32
    %222 = vector.broadcast %cst_74 : f32 to vector<8x32xf32>
    %cst_75 = arith.constant 0.000000e+00 : f32
    %223 = vector.broadcast %cst_75 : f32 to vector<8x32xf32>
    %c0_i32_76 = arith.constant 0 : i32
    %224 = arith.index_cast %c0_i32_76 : i32 to index
    %c0_77 = arith.constant 0 : index
    %c0_78 = arith.constant 0 : index
    %225 = vector.load %arg12[%224, %c0_77, %c0_78] : memref<8x8x128xf32, #tpu.memory_space<vmem>>, vector<1x8x128xf32>
    %226 = vector.shape_cast %225 : vector<1x8x128xf32> to vector<8x128xf32>
    %cst_79 = arith.constant dense<0.000000e+00> : vector<8x128xf32>
    %227 = tpu.matmul %222, %215, %cst_79 {dimension_numbers = #tpu.dot_dimension_numbers<[1], [0], [0], [1], [0, 0, 1, 1], [], []>} : vector<8x32xf32>, vector<32x128xf32>, vector<8x128xf32> -> vector<8x128xf32>
    %228 = arith.addf %226, %227 : vector<8x128xf32>
    %229 = vector.extract_strided_slice %228 {offsets = [0, 0], sizes = [8, 96], strides = [1, 1]} : vector<8x128xf32> to vector<8x96xf32>
    %230 = arith.negf %229 : vector<8x96xf32>
    %231 = math.exp %230 : vector<8x96xf32>
    %cst_80 = arith.constant 1.000000e+00 : f32
    %232 = vector.broadcast %cst_80 : f32 to vector<8x96xf32>
    %233 = arith.addf %232, %231 : vector<8x96xf32>
    %234 = arith.divf %232, %233 : vector<8x96xf32>
    %235 = vector.extract_strided_slice %234 {offsets = [0, 0], sizes = [8, 32], strides = [1, 1]} : vector<8x96xf32> to vector<8x32xf32>
    %236 = vector.extract_strided_slice %234 {offsets = [0, 32], sizes = [8, 32], strides = [1, 1]} : vector<8x96xf32> to vector<8x32xf32>
    %237 = vector.extract_strided_slice %234 {offsets = [0, 64], sizes = [8, 32], strides = [1, 1]} : vector<8x96xf32> to vector<8x32xf32>
    %238 = vector.extract_strided_slice %228 {offsets = [0, 96], sizes = [8, 32], strides = [1, 1]} : vector<8x128xf32> to vector<8x32xf32>
    %239 = math.tanh %238 : vector<8x32xf32>
    %240 = arith.mulf %236, %223 : vector<8x32xf32>
    %241 = arith.mulf %235, %239 : vector<8x32xf32>
    %242 = arith.addf %240, %241 : vector<8x32xf32>
    %243 = math.tanh %242 : vector<8x32xf32>
    %244 = arith.mulf %237, %243 : vector<8x32xf32>
    %c1_i32_81 = arith.constant 1 : i32
    %245 = arith.index_cast %c1_i32_81 : i32 to index
    %c0_82 = arith.constant 0 : index
    %c0_83 = arith.constant 0 : index
    %246 = vector.load %arg12[%245, %c0_82, %c0_83] : memref<8x8x128xf32, #tpu.memory_space<vmem>>, vector<1x8x128xf32>
    %247 = vector.shape_cast %246 : vector<1x8x128xf32> to vector<8x128xf32>
    %cst_84 = arith.constant dense<0.000000e+00> : vector<8x128xf32>
    %248 = tpu.matmul %244, %215, %cst_84 {dimension_numbers = #tpu.dot_dimension_numbers<[1], [0], [0], [1], [0, 0, 1, 1], [], []>} : vector<8x32xf32>, vector<32x128xf32>, vector<8x128xf32> -> vector<8x128xf32>
    %249 = arith.addf %247, %248 : vector<8x128xf32>
    %250 = vector.extract_strided_slice %249 {offsets = [0, 0], sizes = [8, 96], strides = [1, 1]} : vector<8x128xf32> to vector<8x96xf32>
    %251 = arith.negf %250 : vector<8x96xf32>
    %252 = math.exp %251 : vector<8x96xf32>
    %cst_85 = arith.constant 1.000000e+00 : f32
    %253 = vector.broadcast %cst_85 : f32 to vector<8x96xf32>
    %254 = arith.addf %253, %252 : vector<8x96xf32>
    %255 = arith.divf %253, %254 : vector<8x96xf32>
    %256 = vector.extract_strided_slice %255 {offsets = [0, 0], sizes = [8, 32], strides = [1, 1]} : vector<8x96xf32> to vector<8x32xf32>
    %257 = vector.extract_strided_slice %255 {offsets = [0, 32], sizes = [8, 32], strides = [1, 1]} : vector<8x96xf32> to vector<8x32xf32>
    %258 = vector.extract_strided_slice %255 {offsets = [0, 64], sizes = [8, 32], strides = [1, 1]} : vector<8x96xf32> to vector<8x32xf32>
    %259 = vector.extract_strided_slice %249 {offsets = [0, 96], sizes = [8, 32], strides = [1, 1]} : vector<8x128xf32> to vector<8x32xf32>
    %260 = math.tanh %259 : vector<8x32xf32>
    %261 = arith.mulf %257, %242 : vector<8x32xf32>
    %262 = arith.mulf %256, %260 : vector<8x32xf32>
    %263 = arith.addf %261, %262 : vector<8x32xf32>
    %264 = math.tanh %263 : vector<8x32xf32>
    %265 = arith.mulf %258, %264 : vector<8x32xf32>
    %c2_i32_86 = arith.constant 2 : i32
    %266 = arith.index_cast %c2_i32_86 : i32 to index
    %c0_87 = arith.constant 0 : index
    %c0_88 = arith.constant 0 : index
    %267 = vector.load %arg12[%266, %c0_87, %c0_88] : memref<8x8x128xf32, #tpu.memory_space<vmem>>, vector<1x8x128xf32>
    %268 = vector.shape_cast %267 : vector<1x8x128xf32> to vector<8x128xf32>
    %cst_89 = arith.constant dense<0.000000e+00> : vector<8x128xf32>
    %269 = tpu.matmul %265, %215, %cst_89 {dimension_numbers = #tpu.dot_dimension_numbers<[1], [0], [0], [1], [0, 0, 1, 1], [], []>} : vector<8x32xf32>, vector<32x128xf32>, vector<8x128xf32> -> vector<8x128xf32>
    %270 = arith.addf %268, %269 : vector<8x128xf32>
    %271 = vector.extract_strided_slice %270 {offsets = [0, 0], sizes = [8, 96], strides = [1, 1]} : vector<8x128xf32> to vector<8x96xf32>
    %272 = arith.negf %271 : vector<8x96xf32>
    %273 = math.exp %272 : vector<8x96xf32>
    %cst_90 = arith.constant 1.000000e+00 : f32
    %274 = vector.broadcast %cst_90 : f32 to vector<8x96xf32>
    %275 = arith.addf %274, %273 : vector<8x96xf32>
    %276 = arith.divf %274, %275 : vector<8x96xf32>
    %277 = vector.extract_strided_slice %276 {offsets = [0, 0], sizes = [8, 32], strides = [1, 1]} : vector<8x96xf32> to vector<8x32xf32>
    %278 = vector.extract_strided_slice %276 {offsets = [0, 32], sizes = [8, 32], strides = [1, 1]} : vector<8x96xf32> to vector<8x32xf32>
    %279 = vector.extract_strided_slice %276 {offsets = [0, 64], sizes = [8, 32], strides = [1, 1]} : vector<8x96xf32> to vector<8x32xf32>
    %280 = vector.extract_strided_slice %270 {offsets = [0, 96], sizes = [8, 32], strides = [1, 1]} : vector<8x128xf32> to vector<8x32xf32>
    %281 = math.tanh %280 : vector<8x32xf32>
    %282 = arith.mulf %278, %263 : vector<8x32xf32>
    %283 = arith.mulf %277, %281 : vector<8x32xf32>
    %284 = arith.addf %282, %283 : vector<8x32xf32>
    %285 = math.tanh %284 : vector<8x32xf32>
    %286 = arith.mulf %279, %285 : vector<8x32xf32>
    %c3_i32_91 = arith.constant 3 : i32
    %287 = arith.index_cast %c3_i32_91 : i32 to index
    %c0_92 = arith.constant 0 : index
    %c0_93 = arith.constant 0 : index
    %288 = vector.load %arg12[%287, %c0_92, %c0_93] : memref<8x8x128xf32, #tpu.memory_space<vmem>>, vector<1x8x128xf32>
    %289 = vector.shape_cast %288 : vector<1x8x128xf32> to vector<8x128xf32>
    %cst_94 = arith.constant dense<0.000000e+00> : vector<8x128xf32>
    %290 = tpu.matmul %286, %215, %cst_94 {dimension_numbers = #tpu.dot_dimension_numbers<[1], [0], [0], [1], [0, 0, 1, 1], [], []>} : vector<8x32xf32>, vector<32x128xf32>, vector<8x128xf32> -> vector<8x128xf32>
    %291 = arith.addf %289, %290 : vector<8x128xf32>
    %292 = vector.extract_strided_slice %291 {offsets = [0, 0], sizes = [8, 96], strides = [1, 1]} : vector<8x128xf32> to vector<8x96xf32>
    %293 = arith.negf %292 : vector<8x96xf32>
    %294 = math.exp %293 : vector<8x96xf32>
    %cst_95 = arith.constant 1.000000e+00 : f32
    %295 = vector.broadcast %cst_95 : f32 to vector<8x96xf32>
    %296 = arith.addf %295, %294 : vector<8x96xf32>
    %297 = arith.divf %295, %296 : vector<8x96xf32>
    %298 = vector.extract_strided_slice %297 {offsets = [0, 0], sizes = [8, 32], strides = [1, 1]} : vector<8x96xf32> to vector<8x32xf32>
    %299 = vector.extract_strided_slice %297 {offsets = [0, 32], sizes = [8, 32], strides = [1, 1]} : vector<8x96xf32> to vector<8x32xf32>
    %300 = vector.extract_strided_slice %297 {offsets = [0, 64], sizes = [8, 32], strides = [1, 1]} : vector<8x96xf32> to vector<8x32xf32>
    %301 = vector.extract_strided_slice %291 {offsets = [0, 96], sizes = [8, 32], strides = [1, 1]} : vector<8x128xf32> to vector<8x32xf32>
    %302 = math.tanh %301 : vector<8x32xf32>
    %303 = arith.mulf %299, %284 : vector<8x32xf32>
    %304 = arith.mulf %298, %302 : vector<8x32xf32>
    %305 = arith.addf %303, %304 : vector<8x32xf32>
    %306 = math.tanh %305 : vector<8x32xf32>
    %307 = arith.mulf %300, %306 : vector<8x32xf32>
    %c4_i32_96 = arith.constant 4 : i32
    %308 = arith.index_cast %c4_i32_96 : i32 to index
    %c0_97 = arith.constant 0 : index
    %c0_98 = arith.constant 0 : index
    %309 = vector.load %arg12[%308, %c0_97, %c0_98] : memref<8x8x128xf32, #tpu.memory_space<vmem>>, vector<1x8x128xf32>
    %310 = vector.shape_cast %309 : vector<1x8x128xf32> to vector<8x128xf32>
    %cst_99 = arith.constant dense<0.000000e+00> : vector<8x128xf32>
    %311 = tpu.matmul %307, %215, %cst_99 {dimension_numbers = #tpu.dot_dimension_numbers<[1], [0], [0], [1], [0, 0, 1, 1], [], []>} : vector<8x32xf32>, vector<32x128xf32>, vector<8x128xf32> -> vector<8x128xf32>
    %312 = arith.addf %310, %311 : vector<8x128xf32>
    %313 = vector.extract_strided_slice %312 {offsets = [0, 0], sizes = [8, 96], strides = [1, 1]} : vector<8x128xf32> to vector<8x96xf32>
    %314 = arith.negf %313 : vector<8x96xf32>
    %315 = math.exp %314 : vector<8x96xf32>
    %cst_100 = arith.constant 1.000000e+00 : f32
    %316 = vector.broadcast %cst_100 : f32 to vector<8x96xf32>
    %317 = arith.addf %316, %315 : vector<8x96xf32>
    %318 = arith.divf %316, %317 : vector<8x96xf32>
    %319 = vector.extract_strided_slice %318 {offsets = [0, 0], sizes = [8, 32], strides = [1, 1]} : vector<8x96xf32> to vector<8x32xf32>
    %320 = vector.extract_strided_slice %318 {offsets = [0, 32], sizes = [8, 32], strides = [1, 1]} : vector<8x96xf32> to vector<8x32xf32>
    %321 = vector.extract_strided_slice %318 {offsets = [0, 64], sizes = [8, 32], strides = [1, 1]} : vector<8x96xf32> to vector<8x32xf32>
    %322 = vector.extract_strided_slice %312 {offsets = [0, 96], sizes = [8, 32], strides = [1, 1]} : vector<8x128xf32> to vector<8x32xf32>
    %323 = math.tanh %322 : vector<8x32xf32>
    %324 = arith.mulf %320, %305 : vector<8x32xf32>
    %325 = arith.mulf %319, %323 : vector<8x32xf32>
    %326 = arith.addf %324, %325 : vector<8x32xf32>
    %327 = math.tanh %326 : vector<8x32xf32>
    %328 = arith.mulf %321, %327 : vector<8x32xf32>
    %c5_i32_101 = arith.constant 5 : i32
    %329 = arith.index_cast %c5_i32_101 : i32 to index
    %c0_102 = arith.constant 0 : index
    %c0_103 = arith.constant 0 : index
    %330 = vector.load %arg12[%329, %c0_102, %c0_103] : memref<8x8x128xf32, #tpu.memory_space<vmem>>, vector<1x8x128xf32>
    %331 = vector.shape_cast %330 : vector<1x8x128xf32> to vector<8x128xf32>
    %cst_104 = arith.constant dense<0.000000e+00> : vector<8x128xf32>
    %332 = tpu.matmul %328, %215, %cst_104 {dimension_numbers = #tpu.dot_dimension_numbers<[1], [0], [0], [1], [0, 0, 1, 1], [], []>} : vector<8x32xf32>, vector<32x128xf32>, vector<8x128xf32> -> vector<8x128xf32>
    %333 = arith.addf %331, %332 : vector<8x128xf32>
    %334 = vector.extract_strided_slice %333 {offsets = [0, 0], sizes = [8, 96], strides = [1, 1]} : vector<8x128xf32> to vector<8x96xf32>
    %335 = arith.negf %334 : vector<8x96xf32>
    %336 = math.exp %335 : vector<8x96xf32>
    %cst_105 = arith.constant 1.000000e+00 : f32
    %337 = vector.broadcast %cst_105 : f32 to vector<8x96xf32>
    %338 = arith.addf %337, %336 : vector<8x96xf32>
    %339 = arith.divf %337, %338 : vector<8x96xf32>
    %340 = vector.extract_strided_slice %339 {offsets = [0, 0], sizes = [8, 32], strides = [1, 1]} : vector<8x96xf32> to vector<8x32xf32>
    %341 = vector.extract_strided_slice %339 {offsets = [0, 32], sizes = [8, 32], strides = [1, 1]} : vector<8x96xf32> to vector<8x32xf32>
    %342 = vector.extract_strided_slice %339 {offsets = [0, 64], sizes = [8, 32], strides = [1, 1]} : vector<8x96xf32> to vector<8x32xf32>
    %343 = vector.extract_strided_slice %333 {offsets = [0, 96], sizes = [8, 32], strides = [1, 1]} : vector<8x128xf32> to vector<8x32xf32>
    %344 = math.tanh %343 : vector<8x32xf32>
    %345 = arith.mulf %341, %326 : vector<8x32xf32>
    %346 = arith.mulf %340, %344 : vector<8x32xf32>
    %347 = arith.addf %345, %346 : vector<8x32xf32>
    %348 = math.tanh %347 : vector<8x32xf32>
    %349 = arith.mulf %342, %348 : vector<8x32xf32>
    %c6_i32_106 = arith.constant 6 : i32
    %350 = arith.index_cast %c6_i32_106 : i32 to index
    %c0_107 = arith.constant 0 : index
    %c0_108 = arith.constant 0 : index
    %351 = vector.load %arg12[%350, %c0_107, %c0_108] : memref<8x8x128xf32, #tpu.memory_space<vmem>>, vector<1x8x128xf32>
    %352 = vector.shape_cast %351 : vector<1x8x128xf32> to vector<8x128xf32>
    %cst_109 = arith.constant dense<0.000000e+00> : vector<8x128xf32>
    %353 = tpu.matmul %349, %215, %cst_109 {dimension_numbers = #tpu.dot_dimension_numbers<[1], [0], [0], [1], [0, 0, 1, 1], [], []>} : vector<8x32xf32>, vector<32x128xf32>, vector<8x128xf32> -> vector<8x128xf32>
    %354 = arith.addf %352, %353 : vector<8x128xf32>
    %355 = vector.extract_strided_slice %354 {offsets = [0, 0], sizes = [8, 96], strides = [1, 1]} : vector<8x128xf32> to vector<8x96xf32>
    %356 = arith.negf %355 : vector<8x96xf32>
    %357 = math.exp %356 : vector<8x96xf32>
    %cst_110 = arith.constant 1.000000e+00 : f32
    %358 = vector.broadcast %cst_110 : f32 to vector<8x96xf32>
    %359 = arith.addf %358, %357 : vector<8x96xf32>
    %360 = arith.divf %358, %359 : vector<8x96xf32>
    %361 = vector.extract_strided_slice %360 {offsets = [0, 0], sizes = [8, 32], strides = [1, 1]} : vector<8x96xf32> to vector<8x32xf32>
    %362 = vector.extract_strided_slice %360 {offsets = [0, 32], sizes = [8, 32], strides = [1, 1]} : vector<8x96xf32> to vector<8x32xf32>
    %363 = vector.extract_strided_slice %360 {offsets = [0, 64], sizes = [8, 32], strides = [1, 1]} : vector<8x96xf32> to vector<8x32xf32>
    %364 = vector.extract_strided_slice %354 {offsets = [0, 96], sizes = [8, 32], strides = [1, 1]} : vector<8x128xf32> to vector<8x32xf32>
    %365 = math.tanh %364 : vector<8x32xf32>
    %366 = arith.mulf %362, %347 : vector<8x32xf32>
    %367 = arith.mulf %361, %365 : vector<8x32xf32>
    %368 = arith.addf %366, %367 : vector<8x32xf32>
    %369 = math.tanh %368 : vector<8x32xf32>
    %370 = arith.mulf %363, %369 : vector<8x32xf32>
    %c7_i32_111 = arith.constant 7 : i32
    %371 = arith.index_cast %c7_i32_111 : i32 to index
    %c0_112 = arith.constant 0 : index
    %c0_113 = arith.constant 0 : index
    %372 = vector.load %arg12[%371, %c0_112, %c0_113] : memref<8x8x128xf32, #tpu.memory_space<vmem>>, vector<1x8x128xf32>
    %373 = vector.shape_cast %372 : vector<1x8x128xf32> to vector<8x128xf32>
    %cst_114 = arith.constant dense<0.000000e+00> : vector<8x128xf32>
    %374 = tpu.matmul %370, %215, %cst_114 {dimension_numbers = #tpu.dot_dimension_numbers<[1], [0], [0], [1], [0, 0, 1, 1], [], []>} : vector<8x32xf32>, vector<32x128xf32>, vector<8x128xf32> -> vector<8x128xf32>
    %375 = arith.addf %373, %374 : vector<8x128xf32>
    %376 = vector.extract_strided_slice %375 {offsets = [0, 0], sizes = [8, 96], strides = [1, 1]} : vector<8x128xf32> to vector<8x96xf32>
    %377 = arith.negf %376 : vector<8x96xf32>
    %378 = math.exp %377 : vector<8x96xf32>
    %cst_115 = arith.constant 1.000000e+00 : f32
    %379 = vector.broadcast %cst_115 : f32 to vector<8x96xf32>
    %380 = arith.addf %379, %378 : vector<8x96xf32>
    %381 = arith.divf %379, %380 : vector<8x96xf32>
    %382 = vector.extract_strided_slice %381 {offsets = [0, 0], sizes = [8, 32], strides = [1, 1]} : vector<8x96xf32> to vector<8x32xf32>
    %383 = vector.extract_strided_slice %381 {offsets = [0, 32], sizes = [8, 32], strides = [1, 1]} : vector<8x96xf32> to vector<8x32xf32>
    %384 = vector.extract_strided_slice %381 {offsets = [0, 64], sizes = [8, 32], strides = [1, 1]} : vector<8x96xf32> to vector<8x32xf32>
    %385 = vector.extract_strided_slice %375 {offsets = [0, 96], sizes = [8, 32], strides = [1, 1]} : vector<8x128xf32> to vector<8x32xf32>
    %386 = math.tanh %385 : vector<8x32xf32>
    %387 = arith.mulf %383, %368 : vector<8x32xf32>
    %388 = arith.mulf %382, %386 : vector<8x32xf32>
    %389 = arith.addf %387, %388 : vector<8x32xf32>
    %390 = math.tanh %389 : vector<8x32xf32>
    %391 = arith.mulf %384, %390 : vector<8x32xf32>
    %c8_i32_116 = arith.constant 8 : i32
    %c0_117 = arith.constant 0 : index
    %c0_118 = arith.constant 0 : index
    %392 = vector.load %arg8[%c0_117, %c0_118] : memref<32x128xf32, #tpu.memory_space<vmem>>, vector<32x128xf32>
    %cst_119 = arith.constant dense<0.000000e+00> : vector<8x128xf32>
    %393 = tpu.matmul %391, %392, %cst_119 {dimension_numbers = #tpu.dot_dimension_numbers<[1], [0], [0], [1], [0, 0, 1, 1], [], []>} : vector<8x32xf32>, vector<32x128xf32>, vector<8x128xf32> -> vector<8x128xf32>
    %c0_120 = arith.constant 0 : index
    %c0_121 = arith.constant 0 : index
    %394 = vector.load %arg9[%c0_120, %c0_121] : memref<1x128xf32, #tpu.memory_space<vmem>>, vector<1x128xf32>
    %395 = vector.broadcast %394 : vector<1x128xf32> to vector<8x128xf32>
    %396 = arith.addf %393, %395 : vector<8x128xf32>
    %c0_122 = arith.constant 0 : index
    %c0_123 = arith.constant 0 : index
    %397 = vector.load %arg10[%c0_122, %c0_123] : memref<8x128xf32, #tpu.memory_space<vmem>>, vector<8x128xf32>
    tpu.vector_store %arg10[%c0_122, %c0_123], %396 {strides = array<i32>} : memref<8x128xf32, #tpu.memory_space<vmem>>, vector<8x128xf32>,
    return
  }
  func.func @transform_0(%arg0: i32) -> (i32, i32, i32) {
    %c0_i32 = arith.constant 0 : i32
    %c0_i32_0 = arith.constant 0 : i32
    %c0_i32_1 = arith.constant 0 : i32
    return %c0_i32, %arg0, %c0_i32_0 : i32, i32, i32
  }
  func.func @transform_1(%arg0: i32) -> (i32, i32) {
    %c0_i32 = arith.constant 0 : i32
    %c0_i32_0 = arith.constant 0 : i32
    %c0_i32_1 = arith.constant 0 : i32
    return %c0_i32, %c0_i32_0 : i32, i32
  }
  func.func @transform_2(%arg0: i32) -> (i32, i32) {
    %c0_i32 = arith.constant 0 : i32
    %c0_i32_0 = arith.constant 0 : i32
    %c0_i32_1 = arith.constant 0 : i32
    return %c0_i32, %c0_i32_0 : i32, i32
  }
  func.func @transform_3(%arg0: i32) -> (i32, i32) {
    %c0_i32 = arith.constant 0 : i32
    %c0_i32_0 = arith.constant 0 : i32
    %c0_i32_1 = arith.constant 0 : i32
    return %c0_i32, %c0_i32_0 : i32, i32
  }
  func.func @transform_4(%arg0: i32) -> (i32, i32) {
    %c0_i32 = arith.constant 0 : i32
    %c0_i32_0 = arith.constant 0 : i32
    %c0_i32_1 = arith.constant 0 : i32
    return %c0_i32, %c0_i32_0 : i32, i32
  }
  func.func @transform_5(%arg0: i32) -> (i32, i32) {
    %c0_i32 = arith.constant 0 : i32
    %c0_i32_0 = arith.constant 0 : i32
    %c0_i32_1 = arith.constant 0 : i32
    return %c0_i32, %c0_i32_0 : i32, i32
  }
  func.func @transform_6(%arg0: i32) -> (i32, i32) {
    %c0_i32 = arith.constant 0 : i32
    %c0_i32_0 = arith.constant 0 : i32
    %c0_i32_1 = arith.constant 0 : i32
    return %c0_i32, %c0_i32_0 : i32, i32
  }
  func.func @transform_7(%arg0: i32) -> (i32, i32) {
    %c0_i32 = arith.constant 0 : i32
    %c0_i32_0 = arith.constant 0 : i32
    %c0_i32_1 = arith.constant 0 : i32
    return %c0_i32, %c0_i32_0 : i32, i32
  }
  func.func @transform_8(%arg0: i32) -> (i32, i32) {
    %c0_i32 = arith.constant 0 : i32
    %c0_i32_0 = arith.constant 0 : i32
    %c0_i32_1 = arith.constant 0 : i32
    return %c0_i32, %c0_i32_0 : i32, i32
  }
  func.func @transform_9(%arg0: i32) -> (i32, i32) {
    %c0_i32 = arith.constant 0 : i32
    %c0_i32_0 = arith.constant 0 : i32
    return %arg0, %c0_i32 : i32, i32
  }
}

</mosaic_0001>

<bundles_post_ra>
// kernel: rnn_forward.1
= control target key start
LH: loop header
LB: loop body
LE: loop exit
PB: predicated region body
PF: predicated region fallthrough
CT: control target
= control target key end

     0   :  { %vm53_vm0 = vcmask 130048   ;;  %v2712_v0 = vmov 0.0|0.0   ;;  %vm2713_vm1 = vmmov 0   ;;  %v2714_v4 = vmov 0.0   ;;  %s2715_s25 = smov 32   ;;  %s3127_s1 = inlined_call_operand.vmem [shape: f32[16,128], index: 1, kind: input, shape index: {}]   ;;  %s3128_s2 = inlined_call_operand.vmem [shape: f32[32,128], index: 2, kind: input, shape index: {}]   ;;  %s3129_s0 = inlined_call_operand.vmem [shape: f32[8,8,16], index: 0, kind: input, shape index: {}]   ;;  %s3130_s3 = inlined_call_operand.vmem [shape: f32[1,128], index: 3, kind: input, shape index: {}]   ;;  %s3131_s4 = inlined_call_operand.vmem [shape: f32[32,128], index: 4, kind: input, shape index: {}]   ;;  %s3132_s5 = inlined_call_operand.vmem [shape: f32[32,128], index: 5, kind: input, shape index: {}]   ;;  %s3133_s6 = inlined_call_operand.vmem [shape: f32[1,128], index: 6, kind: input, shape index: {}]   ;;  %s3134_s7 = inlined_call_operand.vmem [shape: f32[32,128], index: 7, kind: input, shape index: {}]   ;;  %s3135_s8 = inlined_call_operand.vmem [shape: f32[1,128], index: 8, kind: input, shape index: {}]   ;;  %s3136_s9 = inlined_call_operand.vmem [shape: f32[8,128], index: 9, kind: output, shape index: {}]  }
   0x1   :  { %2469 = vmatprep.subr.bf16.mxu1 %v2712_v0  ;;  %v40_v1 = vld [vmem:[%s3127_s1] sm:$0xff]  ;;  %v41_v2 = vld [vmem:[%s3127_s1 + $0x8] sm:$0xff]  ;;  %2266 = vmatprep.mubr.msk.f32.mxu1 %vm2713_vm1, %v2714_v4  ;;  %v44_v9 = vld [vmem:[%s3128_s2 + $0x10] sm:$0xff]  ;;  %vm192_vm2 = vcmask 261120  }
   0x2   :  { %v42_v3 = vld [vmem:[%s3128_s2] sm:$0xff]  ;;  %v2465_v5 = vpack.c.bf16 %v41_v2, %v40_v1  ;;  %v43_v6 = vld [vmem:[%s3128_s2 + $0x8] sm:$0xff]  ;;  %v45_v10 = vld [vmem:[%s3128_s2 + $0x18] sm:$0xff] }
   0x3   :  { %v32_v7 = vld [vmem:[%s3129_s0] sm:$0xff]  ;;  %v2785_v8 = vpack.c.bf16 %v43_v6, %v42_v3  ;;  %v33_v11 = vld [vmem:[%s3129_s0 + $0x8] sm:$0xff]  ;;  %v2798_v12 = vpack.c.bf16 %v45_v10, %v44_v9  ;;  %v34_v48 = vld [vmem:[%s3129_s0 + $0x10] sm:$0xff] }
   0x4   :  { %2246 = vmatprep.mubr.msk.f32.mxu0 %vm53_vm0, %v32_v7  ;;  %2466 = vmatprep.subr.bf16.mxu0 %v2465_v5  ;;  %v2819_v13 = vld [vmem:[%s3130_s3] ss:$0 sm:$0xff]  ;;  %s2716_s3 = smov 64   ;;  %v35_v49 = vld [vmem:[%s3129_s0 + $0x18] sm:$0xff]  ;;  %v37_v51 = vld [vmem:[%s3129_s0 + $0x28] sm:$0xff] }
   0x5   :  { %2471 = vmatpush3.bf16.msra.mxu1 %v2785_v8  ;;  %2468 = vmatpush3.bf16.msra.mxu0 %v2465_v5  ;;  %v36_v50 = vld [vmem:[%s3129_s0 + $0x20] sm:$0xff]  ;;  %v38_v52 = vld [vmem:[%s3129_s0 + $0x30] sm:$0xff]  ;;  %v39_v53 = vld [vmem:[%s3129_s0 + $0x38] sm:$0xff] }
   0x6   :  { %2472 = vmatprep.subr.bf16.mxu1 %v2712_v0  ;;  %2481 = vmatprep.subr.bf16.mxu0 %v2712_v0 }
   0x8   :  { %2247 = vmatmul.mubr.msk.f32.vlgmr.msra.gmra.mrb[0].mxu0 %vm53_vm0, %v33_v11 }
   0x9   :  { %2474 = vmatpush3.bf16.msra.mxu1 %v2798_v12  ;;  %2483 = vmatpush3.bf16.msra.mxu0 %v2785_v8 }
   0xa   :  { %2475 = vmatprep.subr.bf16.mxu1 %v2712_v0  ;;  %2484 = vmatprep.subr.bf16.mxu0 %v2712_v0 }
   0xb   :  { %2249 = vmatprep.mubr.msk.f32.mxu0 %vm53_vm0, %v34_v48 }
   0xc   :  { %2267 = vmatmul.mubr.f32.vlgmr.msra.gmra.mrb[0].mxu1 %v2714_v4  ;;  %2250 = vmatmul.mubr.msk.f32.gmra.mrb[2].mxu0 %vm53_vm0, %v35_v49 }
   0xd   :  { %2477 = vmatpush3.bf16.msra.mxu1 %v2785_v8  ;;  %2277 = vmatprep.mubr.msk.f32.mxu1 %vm2713_vm1, %v2714_v4 }
   0xe   :  { %2478 = vmatprep.subr.bf16.mxu1 %v2712_v0  ;;  %2486 = vmatpush3.bf16.msra.mxu0 %v2798_v12 }
   0xf   :  { %2493 = vmatprep.subr.bf16.mxu0 %v2712_v0  ;;  %2252 = vmatprep.mubr.msk.f32.mxu0 %vm53_vm0, %v36_v50 }
  0x10   :  { %2253 = vmatmul.mubr.msk.f32.gmra.mrb[4].mxu0 %vm53_vm0, %v37_v51 }
  0x11   :  { %2480 = vmatpush3.bf16.msra.mxu1 %v2798_v12  ;;  %2255 = vmatprep.mubr.msk.f32.mxu0 %vm53_vm0, %v38_v52 }
  0x12   :  { %2487 = vmatprep.subr.bf16.mxu1 %v2712_v0 }
  0x14   :  { %2256 = vmatmul.mubr.msk.f32.gmra.mrb[6].mxu0 %vm53_vm0, %v39_v53 }
  0x15   :  { %2288 = vmatprep.mubr.msk.f32.mxu0 %vm2713_vm1, %v2714_v4 }
  0xdb   :  { %v2248_v14 = vpop.f32.mrb[0].mxu0 }
  0xdc   :  { %v144_v15 = vpop.f32.mrb[1].mxu0  ;;  %v150_v34 = vadd.f32 %v2248_v14, %v2819_v13 }
  0xdd   :  { %v145_v16 = vadd.f32 %v2819_v13, %v144_v15 }
  0xdf   :  { %v262_v17 = vpop.f32.mrb[0].mxu1  ;;  %v2251_v57 = vpop.f32.mrb[2].mxu0 }
  0xe0   :  { %v266_v18 = vadd.f32 %v262_v17, %v145_v16  ;;  %v2268_v19 = vpop.f32.mrb[1].mxu1  ;;  %v154_v58 = vpop.f32.mrb[3].mxu0 }
  0xe1   :  { %v155_v1 = vadd.f32 %v2819_v13, %v154_v58 }
  0xe2   :  { %2584 = vtanh.f32 %v266_v18  ;;  %v2094_v21 = vmul.f32 -1.442695, %v266_v18 }
  0xe3   :  { %v2865_v59 = vpop.f32.mrb[4].mxu0 }
  0xe4   :  { %2586 = vpow2.f32 %v2094_v21  ;;  %v2867_v60 = vpop.f32.mrb[5].mxu0 }
  0xe7   :  { %v2869_v61 = vpop.f32.mrb[6].mxu0 }
  0xe8   :  { %v2871_v62 = vpop.f32.mrb[7].mxu0 }
  0xec   :  { %v2585_v20 = vpop.eup %2584 }
  0xed   :  { %276 = vrot.lane.b32.xlu0 %v2585_v20, %s2715_s25 }
  0xee   :  { %v2587_v22 = vpop.eup %2586 }
  0xef   :  { %v270_v23 = vadd.f32 1.0, %v2587_v22 }
  0xf1   :  { %2588 = vrcp.f32 %v270_v23  ;;  %v160_v23 = vadd.f32 %v2251_v57, %v2819_v13 }
  0xfb   :  { %v2589_v24 = vpop.eup %2588 }
  0xfc   :  { %v274_v27 = vmul.f32 0.0, %v2589_v24 }
 0x15f   :  { %v277_v25 = vpop.permute.xlu0 %276 }
 0x160   :  { %v279_v26 = vmul.f32 %v2589_v24, %v277_v25 }
 0x162   :  { %281 = vrot.lane.b32.xlu0 %v279_v26, %s2715_s25 }
 0x1d4   :  { %v282_v28 = vpop.permute.xlu0 %281 }
 0x1d5   :  { %v284_v29 = vadd.f32 %v282_v28, %v274_v27 }
 0x1d7   :  { %2590 = vtanh.f32 %v284_v29 }
 0x1e1   :  { %v2591_v30 = vpop.eup %2590 }
 0x1e2   :  { %287 = vrot.lane.b32.xlu1 %v2591_v30, %s2715_s25 }
 0x254   :  { %v288_v31 = vpop.permute.xlu1 %287 }
 0x255   :  { %v290_v32 = vmul.f32 %v2589_v24, %v288_v31 }
 0x257   :  { %292 = vrot.lane.b32.xlu1 %v290_v32, %s2716_s3 }
 0x2c9   :  { %v293_v33 = vpop.permute.xlu1 %292 }
 0x2ca   :  { %295 = vst.msk [vmem:[#allocation2] sm:$0xff] %vm192_vm2, %v293_v33  ;;  %2278 = vmatmul.mubr.msk.f32.vlgmr.msra.gmra.mrb[2].mxu1 %vm192_vm2, %v293_v33 }
 0x2cb   :  { %2489 = vmatpush3.bf16.msra.mxu1 %v2785_v8  ;;  %2299 = vmatprep.mubr.msk.f32.mxu1 %vm2713_vm1, %v2714_v4 }
 0x2cc   :  { %2490 = vmatprep.subr.bf16.mxu1 %v2712_v0 }
 0x2cf   :  { %2492 = vmatpush3.bf16.msra.mxu1 %v2798_v12 }
 0x2d0   :  { %2499 = vmatprep.subr.bf16.mxu1 %v2712_v0 }
 0x39d   :  { %v366_v35 = vpop.f32.mrb[2].mxu1 }
 0x39e   :  { %v370_v36 = vadd.f32 %v366_v35, %v150_v34  ;;  %v2279_v37 = vpop.f32.mrb[3].mxu1 }
 0x3a0   :  { %2592 = vtanh.f32 %v370_v36  ;;  %v2096_v39 = vmul.f32 -1.442695, %v370_v36 }
 0x3a2   :  { %2594 = vpow2.f32 %v2096_v39 }
 0x3aa   :  { %v2593_v38 = vpop.eup %2592 }
 0x3ab   :  { %380 = vrot.lane.b32.xlu0 %v2593_v38, %s2715_s25 }
 0x3ac   :  { %v2595_v40 = vpop.eup %2594 }
 0x3ad   :  { %v374_v41 = vadd.f32 1.0, %v2595_v40 }
 0x3af   :  { %2596 = vrcp.f32 %v374_v41  ;;  %v165_v41 = vadd.f32 %v2819_v13, %v2867_v60  ;;  %v170_v60 = vadd.f32 %v2865_v59, %v2819_v13 }
 0x3b9   :  { %v2597_v42 = vpop.eup %2596 }
 0x3ba   :  { %v378_v45 = vmul.f32 %v2597_v42, %v284_v29 }
 0x41d   :  { %v381_v43 = vpop.permute.xlu0 %380 }
 0x41e   :  { %v383_v44 = vmul.f32 %v2597_v42, %v381_v43 }
 0x420   :  { %385 = vrot.lane.b32.xlu1 %v383_v44, %s2715_s25 }
 0x492   :  { %v386_v46 = vpop.permute.xlu1 %385 }
 0x493   :  { %v388_v47 = vadd.f32 %v386_v46, %v378_v45 }
 0x495   :  { %2598 = vtanh.f32 %v388_v47 }
 0x49f   :  { %v2599_v54 = vpop.eup %2598 }
 0x4a0   :  { %391 = vrot.lane.b32.xlu0 %v2599_v54, %s2715_s25 }
 0x512   :  { %v392_v55 = vpop.permute.xlu0 %391 }
 0x513   :  { %v394_v56 = vmul.f32 %v2597_v42, %v392_v55 }
 0x515   :  { %396 = vrot.lane.b32.xlu1 %v394_v56, %s2716_s3 }
 0x587   :  { %v397_v63 = vpop.permute.xlu1 %396 }
 0x588   :  { %400 = vst.msk [vmem:[#allocation2 + $0x8] sm:$0xff] %vm192_vm2, %v397_v63  ;;  %2289 = vmatmul.mubr.msk.f32.vlgmr.msra.gmra.mrb[8].mxu0 %vm192_vm2, %v397_v63 }
 0x589   :  { %2495 = vmatpush3.bf16.msra.mxu0 %v2785_v8  ;;  %2310 = vmatprep.mubr.msk.f32.mxu0 %vm2713_vm1, %v2714_v4 }
 0x58a   :  { %2496 = vmatprep.subr.bf16.mxu0 %v2712_v0 }
 0x58d   :  { %2498 = vmatpush3.bf16.msra.mxu0 %v2798_v12 }
 0x58e   :  { %2505 = vmatprep.subr.bf16.mxu0 %v2712_v0 }
 0x65b   :  { %v471_v2 = vpop.f32.mrb[8].mxu0 }
 0x65c   :  { %v475_v3 = vadd.f32 %v471_v2, %v155_v1  ;;  %v2290_v5 = vpop.f32.mrb[9].mxu0 }
 0x65e   :  { %2600 = vtanh.f32 %v475_v3  ;;  %v2098_v7 = vmul.f32 -1.442695, %v475_v3 }
 0x660   :  { %2602 = vpow2.f32 %v2098_v7 }
 0x668   :  { %v2601_v6 = vpop.eup %2600 }
 0x669   :  { %485 = vrot.lane.b32.xlu0 %v2601_v6, %s2715_s25 }
 0x66a   :  { %v2603_v9 = vpop.eup %2602 }
 0x66b   :  { %v479_v10 = vadd.f32 1.0, %v2603_v9 }
 0x66d   :  { %2604 = vrcp.f32 %v479_v10 }
 0x677   :  { %v2605_v11 = vpop.eup %2604 }
 0x678   :  { %v483_v16 = vmul.f32 %v2605_v11, %v388_v47 }
 0x6db   :  { %v486_v14 = vpop.permute.xlu0 %485 }
 0x6dc   :  { %v488_v15 = vmul.f32 %v2605_v11, %v486_v14  ;;  %v1039_v14 = vld [vmem:[%s3131_s4] sm:$0xff] }
 0x6de   :  { %490 = vrot.lane.b32.xlu1 %v488_v15, %s2715_s25  ;;  %v1040_v15 = vld [vmem:[%s3131_s4 + $0x8] sm:$0xff] }
 0x750   :  { %v491_v17 = vpop.permute.xlu1 %490 }
 0x751   :  { %v493_v18 = vadd.f32 %v491_v17, %v483_v16  ;;  %v2517_v16 = vpack.c.bf16 %v1040_v15, %v1039_v14 }
 0x753   :  { %2606 = vtanh.f32 %v493_v18 }
 0x75d   :  { %v2607_v19 = vpop.eup %2606 }
 0x75e   :  { %496 = vrot.lane.b32.xlu0 %v2607_v19, %s2715_s25 }
 0x7d0   :  { %v497_v20 = vpop.permute.xlu0 %496 }
 0x7d1   :  { %v499_v21 = vmul.f32 %v2605_v11, %v497_v20  ;;  %v1041_v20 = vld [vmem:[%s3131_s4 + $0x10] sm:$0xff] }
 0x7d3   :  { %501 = vrot.lane.b32.xlu1 %v499_v21, %s2716_s3  ;;  %v1042_v21 = vld [vmem:[%s3131_s4 + $0x18] sm:$0xff] }
 0x845   :  { %v502_v22 = vpop.permute.xlu1 %501 }
 0x846   :  { %505 = vst.msk [vmem:[#allocation2 + $0x10] sm:$0xff] %vm192_vm2, %v502_v22  ;;  %2300 = vmatmul.mubr.msk.f32.vlgmr.msra.gmra.mrb[4].mxu1 %vm192_vm2, %v502_v22  ;;  %v2521_v22 = vpack.c.bf16 %v1042_v21, %v1041_v20 }
 0x847   :  { %2501 = vmatpush3.bf16.msra.mxu1 %v2785_v8  ;;  %2321 = vmatprep.mubr.msk.f32.mxu1 %vm2713_vm1, %v2714_v4 }
 0x848   :  { %2502 = vmatprep.subr.bf16.mxu1 %v2712_v0 }
 0x84b   :  { %2504 = vmatpush3.bf16.msra.mxu1 %v2798_v12 }
 0x84c   :  { %2511 = vmatprep.subr.bf16.mxu1 %v2712_v0 }
 0x919   :  { %v576_v24 = vpop.f32.mrb[4].mxu1 }
 0x91a   :  { %v580_v25 = vadd.f32 %v576_v24, %v160_v23  ;;  %v2301_v26 = vpop.f32.mrb[5].mxu1  ;;  %v1031_v24 = vld [vmem:[#allocation2] sm:$0xff] }
 0x91b   :  { %v1033_v26 = vld [vmem:[#allocation2 + $0x10] sm:$0xff] }
 0x91c   :  { %2608 = vtanh.f32 %v580_v25  ;;  %v2100_v28 = vmul.f32 -1.442695, %v580_v25  ;;  %v1032_v25 = vld [vmem:[#allocation2 + $0x8] sm:$0xff] }
 0x91e   :  { %2610 = vpow2.f32 %v2100_v28 }
 0x926   :  { %v2609_v27 = vpop.eup %2608 }
 0x927   :  { %590 = vrot.lane.b32.xlu0 %v2609_v27, %s2715_s25 }
 0x928   :  { %v2611_v29 = vpop.eup %2610 }
 0x929   :  { %v584_v30 = vadd.f32 1.0, %v2611_v29 }
 0x92b   :  { %2612 = vrcp.f32 %v584_v30  ;;  %v175_v30 = vadd.f32 %v2819_v13, %v2871_v62 }
 0x935   :  { %v2613_v31 = vpop.eup %2612 }
 0x936   :  { %v588_v34 = vmul.f32 %v2613_v31, %v493_v18 }
 0x999   :  { %v591_v32 = vpop.permute.xlu0 %590 }
 0x99a   :  { %v593_v33 = vmul.f32 %v2613_v31, %v591_v32 }
 0x99c   :  { %595 = vrot.lane.b32.xlu1 %v593_v33, %s2715_s25 }
 0xa0e   :  { %v596_v35 = vpop.permute.xlu1 %595 }
 0xa0f   :  { %v598_v36 = vadd.f32 %v596_v35, %v588_v34 }
 0xa11   :  { %2614 = vtanh.f32 %v598_v36 }
 0xa1b   :  { %v2615_v37 = vpop.eup %2614 }
 0xa1c   :  { %601 = vrot.lane.b32.xlu0 %v2615_v37, %s2715_s25 }
 0xa8e   :  { %v602_v38 = vpop.permute.xlu0 %601 }
 0xa8f   :  { %v604_v39 = vmul.f32 %v2613_v31, %v602_v38 }
 0xa91   :  { %606 = vrot.lane.b32.xlu1 %v604_v39, %s2716_s3 }
 0xb03   :  { %v607_v40 = vpop.permute.xlu1 %606 }
 0xb04   :  { %610 = vst.msk [vmem:[#allocation2 + $0x18] sm:$0xff] %vm192_vm2, %v607_v40  ;;  %2311 = vmatmul.mubr.msk.f32.vlgmr.msra.gmra.mrb[10].mxu0 %vm192_vm2, %v607_v40 }
 0xb05   :  { %2507 = vmatpush3.bf16.msra.mxu0 %v2785_v8  ;;  %2332 = vmatprep.mubr.msk.f32.mxu0 %vm2713_vm1, %v2714_v4 }
 0xb06   :  { %2508 = vmatprep.subr.bf16.mxu0 %v2712_v0 }
 0xb09   :  { %2510 = vmatpush3.bf16.msra.mxu0 %v2798_v12 }
 0xb0a   :  { %2518 = vmatprep.subr.bf16.mxu0 %v2517_v16 }
 0xb0b   :  { %v1034_v27 = vld [vmem:[#allocation2 + $0x18] sm:$0xff] }
 0xbd7   :  { %v681_v42 = vpop.f32.mrb[10].mxu0 }
 0xbd8   :  { %v685_v43 = vadd.f32 %v681_v42, %v165_v41  ;;  %v2312_v44 = vpop.f32.mrb[11].mxu0 }
 0xbda   :  { %2616 = vtanh.f32 %v685_v43  ;;  %v2102_v46 = vmul.f32 -1.442695, %v685_v43 }
 0xbdc   :  { %2618 = vpow2.f32 %v2102_v46 }
 0xbe4   :  { %v2617_v45 = vpop.eup %2616 }
 0xbe5   :  { %695 = vrot.lane.b32.xlu0 %v2617_v45, %s2715_s25 }
 0xbe6   :  { %v2619_v47 = vpop.eup %2618 }
 0xbe7   :  { %v689_v48 = vadd.f32 1.0, %v2619_v47 }
 0xbe9   :  { %2620 = vrcp.f32 %v689_v48 }
 0xbf3   :  { %v2621_v49 = vpop.eup %2620 }
 0xbf4   :  { %v693_v52 = vmul.f32 %v2621_v49, %v598_v36 }
 0xc57   :  { %v696_v50 = vpop.permute.xlu0 %695 }
 0xc58   :  { %v698_v51 = vmul.f32 %v2621_v49, %v696_v50  ;;  %v1043_v50 = vld [vmem:[%s3132_s5] sm:$0xff] }
 0xc5a   :  { %700 = vrot.lane.b32.xlu1 %v698_v51, %s2715_s25  ;;  %v1044_v51 = vld [vmem:[%s3132_s5 + $0x8] sm:$0xff] }
 0xccc   :  { %v701_v53 = vpop.permute.xlu1 %700 }
 0xccd   :  { %v703_v54 = vadd.f32 %v701_v53, %v693_v52  ;;  %v2971_v52 = vpack.c.bf16 %v1044_v51, %v1043_v50  ;;  %v1045_v53 = vld [vmem:[%s3132_s5 + $0x10] sm:$0xff] }
 0xccf   :  { %2622 = vtanh.f32 %v703_v54 }
 0xcd9   :  { %v2623_v55 = vpop.eup %2622 }
 0xcda   :  { %706 = vrot.lane.b32.xlu0 %v2623_v55, %s2715_s25 }
 0xd4c   :  { %v707_v56 = vpop.permute.xlu0 %706 }
 0xd4d   :  { %v709_v57 = vmul.f32 %v2621_v49, %v707_v56 }
 0xd4f   :  { %711 = vrot.lane.b32.xlu1 %v709_v57, %s2716_s3 }
 0xdc1   :  { %v712_v58 = vpop.permute.xlu1 %711 }
 0xdc2   :  { %715 = vst.msk [vmem:[#allocation2 + $0x20] sm:$0xff] %vm192_vm2, %v712_v58  ;;  %2322 = vmatmul.mubr.msk.f32.vlgmr.msra.gmra.mrb[6].mxu1 %vm192_vm2, %v712_v58 }
 0xdc3   :  { %2513 = vmatpush3.bf16.msra.mxu1 %v2785_v8  ;;  %2343 = vmatprep.mubr.msk.f32.mxu1 %vm2713_vm1, %v2714_v4 }
 0xdc4   :  { %2514 = vmatprep.subr.bf16.mxu1 %v2712_v0 }
 0xdc7   :  { %2516 = vmatpush3.bf16.msra.mxu1 %v2798_v12 }
 0xdc8   :  { %2525 = vmatprep.subr.bf16.mxu1 %v2712_v0 }
 0xdc9   :  { %v1035_v28 = vld [vmem:[#allocation2 + $0x20] sm:$0xff] }
 0xe95   :  { %v786_v63 = vpop.f32.mrb[6].mxu1 }
 0xe96   :  { %v790_v1 = vadd.f32 %v786_v63, %v170_v60  ;;  %v2323_v2 = vpop.f32.mrb[7].mxu1  ;;  %v180_v63 = vadd.f32 %v2869_v61, %v2819_v13 }
 0xe98   :  { %2624 = vtanh.f32 %v790_v1  ;;  %v2104_v8 = vmul.f32 -1.442695, %v790_v1 }
 0xe9a   :  { %2626 = vpow2.f32 %v2104_v8  ;;  %v3007_v8 = vld [vmem:[%s3133_s6] ss:$0 sm:$0xff] }
 0xea2   :  { %v2625_v3 = vpop.eup %2624 }
 0xea3   :  { %800 = vrot.lane.b32.xlu0 %v2625_v3, %s2715_s25 }
 0xea4   :  { %v2627_v5 = vpop.eup %2626 }
 0xea5   :  { %v794_v6 = vadd.f32 1.0, %v2627_v5 }
 0xea7   :  { %2628 = vrcp.f32 %v794_v6 }
 0xeb1   :  { %v2629_v7 = vpop.eup %2628 }
 0xeb2   :  { %v798_v10 = vmul.f32 %v2629_v7, %v703_v54  ;;  %v1046_v54 = vld [vmem:[%s3132_s5 + $0x18] sm:$0xff] }
 0xeb3   :  { %v2981_v55 = vpack.c.bf16 %v1046_v54, %v1045_v53 }
 0xf15   :  { %v801_v9 = vpop.permute.xlu0 %800 }
 0xf16   :  { %v803_v12 = vmul.f32 %v2629_v7, %v801_v9 }
 0xf18   :  { %805 = vrot.lane.b32.xlu1 %v803_v12, %s2715_s25 }
 0xf8a   :  { %v806_v11 = vpop.permute.xlu1 %805 }
 0xf8b   :  { %v808_v59 = vadd.f32 %v806_v11, %v798_v10 }
 0xf8d   :  { %2630 = vtanh.f32 %v808_v59 }
 0xf97   :  { %v2631_v17 = vpop.eup %2630 }
 0xf98   :  { %811 = vrot.lane.b32.xlu0 %v2631_v17, %s2715_s25 }
0x100a   :  { %v812_v18 = vpop.permute.xlu0 %811 }
0x100b   :  { %v814_v19 = vmul.f32 %v2629_v7, %v812_v18 }
0x100d   :  { %816 = vrot.lane.b32.xlu1 %v814_v19, %s2716_s3 }
0x107f   :  { %v817_v23 = vpop.permute.xlu1 %816 }
0x1080   :  { %820 = vst.msk [vmem:[#allocation2 + $0x28] sm:$0xff] %vm192_vm2, %v817_v23  ;;  %2333 = vmatmul.mubr.msk.f32.vlgmr.msra.gmra.mrb[12].mxu0 %vm192_vm2, %v817_v23 }
0x1081   :  { %2520 = vmatpush3.bf16.msra.mxu0 %v2517_v16  ;;  %2354 = vmatprep.mubr.msk.f32.mxu0 %vm192_vm2, %v1031_v24 }
0x1082   :  { %2522 = vmatprep.subr.bf16.mxu0 %v2521_v22 }
0x1085   :  { %2524 = vmatpush3.bf16.msra.mxu0 %v2521_v22 }
0x1086   :  { %2537 = vmatprep.subr.bf16.mxu0 %v2712_v0 }
0x1087   :  { %v1036_v29 = vld [vmem:[#allocation2 + $0x28] sm:$0xff] }
0x1088   :  { %2355 = vmatmul.mubr.msk.f32.vlgmr.msra.gmra.mrb[14].mxu0 %vm192_vm2, %v1032_v25 }
0x1089   :  { %2357 = vmatprep.mubr.msk.f32.mxu0 %vm192_vm2, %v1033_v26  ;;  %2539 = vmatpush3.bf16.msra.mxu0 %v2971_v52 }
0x108a   :  { %2540 = vmatprep.subr.bf16.mxu0 %v2712_v0 }
0x108c   :  { %2358 = vmatmul.mubr.msk.f32.gmra.mrb[16].mxu0 %vm192_vm2, %v1034_v27 }
0x108d   :  { %2360 = vmatprep.mubr.msk.f32.mxu0 %vm192_vm2, %v1035_v28  ;;  %2542 = vmatpush3.bf16.msra.mxu0 %v2981_v55 }
0x108e   :  { %2549 = vmatprep.subr.bf16.mxu0 %v2712_v0 }
0x1090   :  { %2361 = vmatmul.mubr.msk.f32.gmra.mrb[18].mxu0 %vm192_vm2, %v1036_v29 }
0x1153   :  { %v891_v31 = vpop.f32.mrb[12].mxu0 }
0x1154   :  { %v895_v32 = vadd.f32 %v891_v31, %v175_v30  ;;  %v2334_v33 = vpop.f32.mrb[13].mxu0 }
0x1156   :  { %2632 = vtanh.f32 %v895_v32  ;;  %v2106_v41 = vmul.f32 -1.442695, %v895_v32 }
0x1158   :  { %2634 = vpow2.f32 %v2106_v41 }
0x115b   :  { %v2949_v34 = vpop.f32.mrb[14].mxu0 }
0x115c   :  { %v1144_v35 = vpop.f32.mrb[15].mxu0 }
0x115d   :  { %v1145_v5 = vadd.f32 %v3007_v8, %v1144_v35 }
0x115f   :  { %v2951_v36 = vpop.f32.mrb[16].mxu0 }
0x1160   :  { %v2633_v37 = vpop.eup %2632  ;;  %v2953_v38 = vpop.f32.mrb[17].mxu0 }
0x1161   :  { %905 = vrot.lane.b32.xlu0 %v2633_v37, %s2715_s25  ;;  %v1150_v37 = vadd.f32 %v2949_v34, %v3007_v8 }
0x1162   :  { %v2635_v62 = vpop.eup %2634 }
0x1163   :  { %v2956_v39 = vpop.f32.mrb[18].mxu0  ;;  %v899_v42 = vadd.f32 1.0, %v2635_v62 }
0x1164   :  { %v2958_v40 = vpop.f32.mrb[19].mxu0 }
0x1165   :  { %2636 = vrcp.f32 %v899_v42 }
0x116f   :  { %v2637_v43 = vpop.eup %2636 }
0x1170   :  { %v903_v46 = vmul.f32 %v2637_v43, %v808_v59 }
0x11d3   :  { %v906_v44 = vpop.permute.xlu0 %905 }
0x11d4   :  { %v908_v45 = vmul.f32 %v2637_v43, %v906_v44 }
0x11d6   :  { %910 = vrot.lane.b32.xlu1 %v908_v45, %s2715_s25 }
0x1248   :  { %v911_v47 = vpop.permute.xlu1 %910 }
0x1249   :  { %v2961_v48 = vadd.f32 %v911_v47, %v903_v46 }
0x124b   :  { %2638 = vtanh.f32 %v2961_v48 }
0x1255   :  { %v2639_v49 = vpop.eup %2638 }
0x1256   :  { %916 = vrot.lane.b32.xlu0 %v2639_v49, %s2715_s25 }
0x12c8   :  { %v917_v56 = vpop.permute.xlu0 %916 }
0x12c9   :  { %v919_v57 = vmul.f32 %v2637_v43, %v917_v56 }
0x12cb   :  { %921 = vrot.lane.b32.xlu1 %v919_v57, %s2716_s3 }
0x133d   :  { %v922_v58 = vpop.permute.xlu1 %921 }
0x133e   :  { %925 = vst.msk [vmem:[#allocation2 + $0x30] sm:$0xff] %vm192_vm2, %v922_v58  ;;  %2344 = vmatmul.mubr.msk.f32.vlgmr.msra.gmra.mrb[8].mxu1 %vm192_vm2, %v922_v58 }
0x133f   :  { %2527 = vmatpush3.bf16.msra.mxu1 %v2971_v52  ;;  %2374 = vmatprep.mubr.msk.f32.mxu1 %vm2713_vm1, %v2714_v4 }
0x1340   :  { %2528 = vmatprep.subr.bf16.mxu1 %v2712_v0 }
0x1343   :  { %2530 = vmatpush3.bf16.msra.mxu1 %v2981_v55 }
0x1344   :  { %2531 = vmatprep.subr.bf16.mxu1 %v2712_v0 }
0x1345   :  { %v1037_v60 = vld [vmem:[#allocation2 + $0x30] sm:$0xff] }
0x1346   :  { %2375 = vmatmul.mubr.f32.vlgmr.msra.gmra.mrb[10].mxu1 %v2714_v4  ;;  %2363 = vmatprep.mubr.msk.f32.mxu0 %vm192_vm2, %v1037_v60 }
0x1347   :  { %2533 = vmatpush3.bf16.msra.mxu1 %v2971_v52  ;;  %2385 = vmatprep.mubr.msk.f32.mxu1 %vm2713_vm1, %v2714_v4 }
0x1348   :  { %2534 = vmatprep.subr.bf16.mxu1 %v2712_v0 }
0x134b   :  { %2536 = vmatpush3.bf16.msra.mxu1 %v2981_v55 }
0x134c   :  { %2543 = vmatprep.subr.bf16.mxu1 %v2712_v0 }
0x1411   :  { %v996_v1 = vpop.f32.mrb[8].mxu1 }
0x1412   :  { %v1000_v2 = vadd.f32 %v996_v1, %v180_v63  ;;  %v2345_v3 = vpop.f32.mrb[9].mxu1 }
0x1414   :  { %v2108_v20 = vmul.f32 -1.442695, %v1000_v2 }
0x1419   :  { %v1258_v6 = vpop.f32.mrb[10].mxu1 }
0x141a   :  { %v1262_v7 = vadd.f32 %v1258_v6, %v1145_v5  ;;  %v2376_v9 = vpop.f32.mrb[11].mxu1 }
0x141c   :  { %2640 = vtanh.f32 %v1262_v7  ;;  %v2118_v10 = vmul.f32 -1.442695, %v1262_v7 }
0x141e   :  { %2642 = vpow2.f32 %v2118_v10 }
0x1426   :  { %v2641_v12 = vpop.eup %2640 }
0x1427   :  { %1272 = vrot.lane.b32.xlu0 %v2641_v12, %s2715_s25 }
0x1428   :  { %v2643_v13 = vpop.eup %2642 }
0x1429   :  { %v1266_v61 = vadd.f32 1.0, %v2643_v13 }
0x142b   :  { %2644 = vrcp.f32 %v1266_v61 }
0x1435   :  { %v2645_v11 = vpop.eup %2644 }
0x1436   :  { %v1270_v15 = vmul.f32 0.0, %v2645_v11 }
0x1499   :  { %v1273_v59 = vpop.permute.xlu0 %1272 }
0x149a   :  { %v1275_v14 = vmul.f32 %v2645_v11, %v1273_v59 }
0x149c   :  { %1277 = vrot.lane.b32.xlu1 %v1275_v14, %s2715_s25 }
0x150e   :  { %v1278_v16 = vpop.permute.xlu1 %1277 }
0x150f   :  { %v1280_v17 = vadd.f32 %v1278_v16, %v1270_v15 }
0x1511   :  { %2646 = vtanh.f32 %v1280_v17 }
0x1512   :  { %2648 = vtanh.f32 %v1000_v2  ;;  %v1155_v2 = vadd.f32 %v3007_v8, %v2953_v38 }
0x1513   :  { %2650 = vpow2.f32 %v2108_v20 }
0x151b   :  { %v2647_v18 = vpop.eup %2646 }
0x151c   :  { %1283 = vrot.lane.b32.xlu0 %v2647_v18, %s2715_s25  ;;  %v2649_v19 = vpop.eup %2648 }
0x151d   :  { %v2651_v21 = vpop.eup %2650 }
0x151e   :  { %v1004_v22 = vadd.f32 1.0, %v2651_v21 }
0x1520   :  { %1010 = vrot.lane.b32.xlu0 %v2649_v19, %s2715_s25  ;;  %2652 = vrcp.f32 %v1004_v22  ;;  %v1160_v19 = vadd.f32 %v2951_v36, %v3007_v8 }
0x152a   :  { %v2653_v25 = vpop.eup %2652 }
0x152b   :  { %v1008_v29 = vmul.f32 %v2653_v25, %v2961_v48 }
0x158e   :  { %v1284_v23 = vpop.permute.xlu0 %1283 }
0x158f   :  { %v1286_v24 = vmul.f32 %v2645_v11, %v1284_v23 }
0x1591   :  { %1289 = vrot.lane.b32.xlu1 %v1286_v24, %s2716_s3 }
0x1592   :  { %v1011_v26 = vpop.permute.xlu0 %1010 }
0x1593   :  { %v1013_v27 = vmul.f32 %v2653_v25, %v1011_v26 }
0x1595   :  { %1015 = vrot.lane.b32.xlu0 %v1013_v27, %s2715_s25 }
0x1603   :  { %v1290_v28 = vpop.permute.xlu1 %1289 }
0x1604   :  { %2386 = vmatmul.mubr.msk.f32.vlgmr.msra.gmra.mrb[12].mxu1 %vm192_vm2, %v1290_v28 }
0x1605   :  { %2545 = vmatpush3.bf16.msra.mxu1 %v2971_v52  ;;  %2407 = vmatprep.mubr.msk.f32.mxu1 %vm2713_vm1, %v2714_v4 }
0x1606   :  { %2546 = vmatprep.subr.bf16.mxu1 %v2712_v0 }
0x1607   :  { %v1016_v30 = vpop.permute.xlu0 %1015 }
0x1608   :  { %v1018_v31 = vadd.f32 %v1016_v30, %v1008_v29 }
0x1609   :  { %2548 = vmatpush3.bf16.msra.mxu1 %v2981_v55 }
0x160a   :  { %2654 = vtanh.f32 %v1018_v31  ;;  %2555 = vmatprep.subr.bf16.mxu1 %v2712_v0 }
0x1614   :  { %v2655_v32 = vpop.eup %2654 }
0x1615   :  { %1021 = vrot.lane.b32.xlu0 %v2655_v32, %s2715_s25 }
0x1687   :  { %v1022_v33 = vpop.permute.xlu0 %1021 }
0x1688   :  { %v1024_v35 = vmul.f32 %v2653_v25, %v1022_v33 }
0x168a   :  { %1026 = vrot.lane.b32.xlu0 %v1024_v35, %s2716_s3 }
0x16d7   :  { %v1359_v41 = vpop.f32.mrb[12].mxu1 }
0x16d8   :  { %v1363_v62 = vadd.f32 %v1359_v41, %v1150_v37  ;;  %v2387_v42 = vpop.f32.mrb[13].mxu1  ;;  %v1165_v41 = vadd.f32 %v3007_v8, %v2958_v40 }
0x16da   :  { %2656 = vtanh.f32 %v1363_v62  ;;  %v2120_v46 = vmul.f32 -1.442695, %v1363_v62 }
0x16dc   :  { %2658 = vpow2.f32 %v2120_v46 }
0x16e4   :  { %v2657_v43 = vpop.eup %2656 }
0x16e5   :  { %1373 = vrot.lane.b32.xlu1 %v2657_v43, %s2715_s25 }
0x16e6   :  { %v2659_v47 = vpop.eup %2658 }
0x16e7   :  { %v1367_v34 = vadd.f32 1.0, %v2659_v47 }
0x16e9   :  { %2660 = vrcp.f32 %v1367_v34 }
0x16f3   :  { %v2661_v48 = vpop.eup %2660 }
0x16f4   :  { %v1371_v51 = vmul.f32 %v2661_v48, %v1280_v17 }
0x16fc   :  { %v1027_v44 = vpop.permute.xlu0 %1026 }
0x16fd   :  { %1030 = vst.msk [vmem:[#allocation2 + $0x38] sm:$0xff] %vm192_vm2, %v1027_v44 }
0x1704   :  { %v1038_v45 = vld [vmem:[#allocation2 + $0x38] sm:$0xff] }
0x1705   :  { %2364 = vmatmul.mubr.msk.f32.gmra.mrb[20].mxu0 %vm192_vm2, %v1038_v45 }
0x1706   :  { %2396 = vmatprep.mubr.msk.f32.mxu0 %vm2713_vm1, %v2714_v4 }
0x1757   :  { %v1374_v49 = vpop.permute.xlu1 %1373 }
0x1758   :  { %v1376_v50 = vmul.f32 %v2661_v48, %v1374_v49 }
0x175a   :  { %1378 = vrot.lane.b32.xlu1 %v1376_v50, %s2715_s25 }
0x17cc   :  { %v1379_v53 = vpop.permute.xlu1 %1378 }
0x17cd   :  { %v1381_v54 = vadd.f32 %v1379_v53, %v1371_v51 }
0x17cf   :  { %2662 = vtanh.f32 %v1381_v54 }
0x17d8   :  { %v3034_v56 = vpop.f32.mrb[20].mxu0 }
0x17d9   :  { %v2663_v57 = vpop.eup %2662  ;;  %v3036_v58 = vpop.f32.mrb[21].mxu0 }
0x17da   :  { %1384 = vrot.lane.b32.xlu1 %v2663_v57, %s2715_s25 }
0x184c   :  { %v1385_v60 = vpop.permute.xlu1 %1384 }
0x184d   :  { %v1387_v63 = vmul.f32 %v2661_v48, %v1385_v60 }
0x184f   :  { %1390 = vrot.lane.b32.xlu1 %v1387_v63, %s2716_s3  ;;  %v1170_v63 = vadd.f32 %v2956_v39, %v3007_v8 }
0x18c1   :  { %v1391_v1 = vpop.permute.xlu1 %1390 }
0x18c2   :  { %2397 = vmatmul.mubr.msk.f32.vlgmr.msra.gmra.mrb[22].mxu0 %vm192_vm2, %v1391_v1 }
0x18c3   :  { %2551 = vmatpush3.bf16.msra.mxu0 %v2971_v52  ;;  %2418 = vmatprep.mubr.msk.f32.mxu0 %vm2713_vm1, %v2714_v4 }
0x18c4   :  { %2552 = vmatprep.subr.bf16.mxu0 %v2712_v0 }
0x18c7   :  { %2554 = vmatpush3.bf16.msra.mxu0 %v2981_v55 }
0x18c8   :  { %2561 = vmatprep.subr.bf16.mxu0 %v2712_v0 }
0x1995   :  { %v1460_v3 = vpop.f32.mrb[22].mxu0 }
0x1996   :  { %v1464_v5 = vadd.f32 %v1460_v3, %v1155_v2  ;;  %v2398_v6 = vpop.f32.mrb[23].mxu0 }
0x1998   :  { %2664 = vtanh.f32 %v1464_v5  ;;  %v2122_v9 = vmul.f32 -1.442695, %v1464_v5 }
0x199a   :  { %2666 = vpow2.f32 %v2122_v9 }
0x19a2   :  { %v2665_v7 = vpop.eup %2664 }
0x19a3   :  { %1474 = vrot.lane.b32.xlu0 %v2665_v7, %s2715_s25 }
0x19a4   :  { %v2667_v12 = vpop.eup %2666 }
0x19a5   :  { %v1468_v10 = vadd.f32 1.0, %v2667_v12 }
0x19a7   :  { %2668 = vrcp.f32 %v1468_v10 }
0x19b1   :  { %v2669_v13 = vpop.eup %2668 }
0x19b2   :  { %v1472_v59 = vmul.f32 %v2669_v13, %v1381_v54 }
0x1a15   :  { %v1475_v61 = vpop.permute.xlu0 %1474 }
0x1a16   :  { %v1477_v11 = vmul.f32 %v2669_v13, %v1475_v61 }
0x1a18   :  { %1479 = vrot.lane.b32.xlu1 %v1477_v11, %s2715_s25 }
0x1a8a   :  { %v1480_v14 = vpop.permute.xlu1 %1479 }
0x1a8b   :  { %v1482_v38 = vadd.f32 %v1480_v14, %v1472_v59 }
0x1a8d   :  { %2670 = vtanh.f32 %v1482_v38 }
0x1a97   :  { %v2671_v15 = vpop.eup %2670 }
0x1a98   :  { %1485 = vrot.lane.b32.xlu0 %v2671_v15, %s2715_s25 }
0x1b0a   :  { %v1486_v16 = vpop.permute.xlu0 %1485 }
0x1b0b   :  { %v1488_v17 = vmul.f32 %v2669_v13, %v1486_v16 }
0x1b0d   :  { %1491 = vrot.lane.b32.xlu1 %v1488_v17, %s2716_s3 }
0x1b7f   :  { %v1492_v18 = vpop.permute.xlu1 %1491 }
0x1b80   :  { %2408 = vmatmul.mubr.msk.f32.vlgmr.msra.gmra.mrb[14].mxu1 %vm192_vm2, %v1492_v18 }
0x1b81   :  { %2557 = vmatpush3.bf16.msra.mxu1 %v2971_v52  ;;  %2429 = vmatprep.mubr.msk.f32.mxu1 %vm2713_vm1, %v2714_v4 }
0x1b82   :  { %2558 = vmatprep.subr.bf16.mxu1 %v2712_v0 }
0x1b85   :  { %2560 = vmatpush3.bf16.msra.mxu1 %v2981_v55 }
0x1b86   :  { %2567 = vmatprep.subr.bf16.mxu1 %v2712_v0 }
0x1c53   :  { %v1561_v20 = vpop.f32.mrb[14].mxu1 }
0x1c54   :  { %v1565_v21 = vadd.f32 %v1561_v20, %v1160_v19  ;;  %v2409_v22 = vpop.f32.mrb[15].mxu1 }
0x1c56   :  { %2672 = vtanh.f32 %v1565_v21  ;;  %v2124_v24 = vmul.f32 -1.442695, %v1565_v21 }
0x1c58   :  { %2674 = vpow2.f32 %v2124_v24 }
0x1c60   :  { %v2673_v23 = vpop.eup %2672 }
0x1c61   :  { %1575 = vrot.lane.b32.xlu0 %v2673_v23, %s2715_s25 }
0x1c62   :  { %v2675_v25 = vpop.eup %2674 }
0x1c63   :  { %v1569_v26 = vadd.f32 1.0, %v2675_v25 }
0x1c65   :  { %2676 = vrcp.f32 %v1569_v26 }
0x1c6f   :  { %v2677_v27 = vpop.eup %2676 }
0x1c70   :  { %v1573_v30 = vmul.f32 %v2677_v27, %v1482_v38  ;;  %v1175_v38 = vadd.f32 %v3007_v8, %v3036_v58 }
0x1cd3   :  { %v1576_v28 = vpop.permute.xlu0 %1575 }
0x1cd4   :  { %v1578_v29 = vmul.f32 %v2677_v27, %v1576_v28 }
0x1cd6   :  { %1580 = vrot.lane.b32.xlu1 %v1578_v29, %s2715_s25 }
0x1d48   :  { %v1581_v31 = vpop.permute.xlu1 %1580 }
0x1d49   :  { %v1583_v36 = vadd.f32 %v1581_v31, %v1573_v30  ;;  %v1180_v30 = vadd.f32 %v3034_v56, %v3007_v8  ;;  %v1994_v56 = vld [vmem:[%s3134_s7] sm:$0xff] }
0x1d4b   :  { %2678 = vtanh.f32 %v1583_v36 }
0x1d55   :  { %v2679_v32 = vpop.eup %2678 }
0x1d56   :  { %1586 = vrot.lane.b32.xlu0 %v2679_v32, %s2715_s25 }
0x1dc8   :  { %v1587_v33 = vpop.permute.xlu0 %1586 }
0x1dc9   :  { %v1589_v35 = vmul.f32 %v2677_v27, %v1587_v33 }
0x1dcb   :  { %1592 = vrot.lane.b32.xlu1 %v1589_v35, %s2716_s3 }
0x1e3d   :  { %v1593_v37 = vpop.permute.xlu1 %1592 }
0x1e3e   :  { %2419 = vmatmul.mubr.msk.f32.vlgmr.msra.gmra.mrb[24].mxu0 %vm192_vm2, %v1593_v37 }
0x1e3f   :  { %2563 = vmatpush3.bf16.msra.mxu0 %v2971_v52  ;;  %2440 = vmatprep.mubr.msk.f32.mxu0 %vm2713_vm1, %v2714_v4 }
0x1e40   :  { %2564 = vmatprep.subr.bf16.mxu0 %v2712_v0 }
0x1e43   :  { %2566 = vmatpush3.bf16.msra.mxu0 %v2981_v55 }
0x1e44   :  { %2573 = vmatprep.subr.bf16.mxu0 %v2712_v0 }
0x1f11   :  { %v1662_v62 = vpop.f32.mrb[24].mxu0 }
0x1f12   :  { %v1666_v42 = vadd.f32 %v1662_v62, %v1165_v41  ;;  %v2420_v43 = vpop.f32.mrb[25].mxu0 }
0x1f14   :  { %2680 = vtanh.f32 %v1666_v42  ;;  %v2126_v45 = vmul.f32 -1.442695, %v1666_v42 }
0x1f16   :  { %2682 = vpow2.f32 %v2126_v45 }
0x1f1e   :  { %v2681_v44 = vpop.eup %2680 }
0x1f1f   :  { %1676 = vrot.lane.b32.xlu0 %v2681_v44, %s2715_s25 }
0x1f20   :  { %v2683_v46 = vpop.eup %2682 }
0x1f21   :  { %v1670_v47 = vadd.f32 1.0, %v2683_v46  ;;  %v1995_v46 = vld [vmem:[%s3134_s7 + $0x8] sm:$0xff] }
0x1f23   :  { %2684 = vrcp.f32 %v1670_v47  ;;  %v1996_v47 = vld [vmem:[%s3134_s7 + $0x10] sm:$0xff] }
0x1f2d   :  { %v2685_v34 = vpop.eup %2684 }
0x1f2e   :  { %v1674_v50 = vmul.f32 %v2685_v34, %v1583_v36 }
0x1f91   :  { %v1677_v48 = vpop.permute.xlu0 %1676 }
0x1f92   :  { %v1679_v49 = vmul.f32 %v2685_v34, %v1677_v48  ;;  %v1997_v48 = vld [vmem:[%s3134_s7 + $0x18] sm:$0xff] }
0x1f94   :  { %1681 = vrot.lane.b32.xlu1 %v1679_v49, %s2715_s25  ;;  %v2577_v49 = vpack.c.bf16 %v1997_v48, %v1996_v47 }
0x2006   :  { %v1682_v51 = vpop.permute.xlu1 %1681 }
0x2007   :  { %v1684_v40 = vadd.f32 %v1682_v51, %v1674_v50 }
0x2009   :  { %2686 = vtanh.f32 %v1684_v40 }
0x2013   :  { %v2687_v53 = vpop.eup %2686 }
0x2014   :  { %1687 = vrot.lane.b32.xlu0 %v2687_v53, %s2715_s25 }
0x2086   :  { %v1688_v54 = vpop.permute.xlu0 %1687 }
0x2087   :  { %v1690_v57 = vmul.f32 %v2685_v34, %v1688_v54  ;;  %v2574_v34 = vpack.c.bf16 %v1995_v46, %v1994_v56  ;;  %v2133_v54 = vld [vmem:[%s3135_s8] ss:$0 sm:$0xff] }
0x2089   :  { %1693 = vrot.lane.b32.xlu1 %v1690_v57, %s2716_s3 }
0x20fb   :  { %v1694_v60 = vpop.permute.xlu1 %1693 }
0x20fc   :  { %2430 = vmatmul.mubr.msk.f32.vlgmr.msra.gmra.mrb[16].mxu1 %vm192_vm2, %v1694_v60 }
0x20fd   :  { %2569 = vmatpush3.bf16.msra.mxu1 %v2971_v52  ;;  %2451 = vmatprep.mubr.msk.f32.mxu1 %vm2713_vm1, %v2714_v4 }
0x20fe   :  { %2570 = vmatprep.subr.bf16.mxu1 %v2712_v0 }
0x2101   :  { %2572 = vmatpush3.bf16.msra.mxu1 %v2981_v55 }
0x21cf   :  { %v1763_v1 = vpop.f32.mrb[16].mxu1 }
0x21d0   :  { %v1767_v2 = vadd.f32 %v1763_v1, %v1170_v63  ;;  %v2431_v3 = vpop.f32.mrb[17].mxu1 }
0x21d2   :  { %2688 = vtanh.f32 %v1767_v2  ;;  %v2128_v6 = vmul.f32 -1.442695, %v1767_v2 }
0x21d4   :  { %2690 = vpow2.f32 %v2128_v6 }
0x21dc   :  { %v2689_v5 = vpop.eup %2688 }
0x21dd   :  { %1777 = vrot.lane.b32.xlu0 %v2689_v5, %s2715_s25 }
0x21de   :  { %v2691_v52 = vpop.eup %2690 }
0x21df   :  { %v1771_v7 = vadd.f32 1.0, %v2691_v52 }
0x21e1   :  { %2692 = vrcp.f32 %v1771_v7 }
0x21eb   :  { %v2693_v9 = vpop.eup %2692 }
0x21ec   :  { %v1775_v55 = vmul.f32 %v2693_v9, %v1684_v40 }
0x224f   :  { %v1778_v12 = vpop.permute.xlu0 %1777 }
0x2250   :  { %v1780_v10 = vmul.f32 %v2693_v9, %v1778_v12 }
0x2252   :  { %1782 = vrot.lane.b32.xlu1 %v1780_v10, %s2715_s25 }
0x22c4   :  { %v1783_v13 = vpop.permute.xlu1 %1782 }
0x22c5   :  { %v1785_v39 = vadd.f32 %v1783_v13, %v1775_v55 }
0x22c7   :  { %2694 = vtanh.f32 %v1785_v39 }
0x22d1   :  { %v2695_v61 = vpop.eup %2694 }
0x22d2   :  { %1788 = vrot.lane.b32.xlu0 %v2695_v61, %s2715_s25 }
0x2344   :  { %v1789_v11 = vpop.permute.xlu0 %1788 }
0x2345   :  { %v1791_v59 = vmul.f32 %v2693_v9, %v1789_v11 }
0x2347   :  { %1794 = vrot.lane.b32.xlu1 %v1791_v59, %s2716_s3 }
0x23b9   :  { %v1795_v14 = vpop.permute.xlu1 %1794 }
0x23ba   :  { %2441 = vmatmul.mubr.msk.f32.vlgmr.msra.gmra.mrb[26].mxu0 %vm192_vm2, %v1795_v14 }
0x23bb   :  { %2462 = vmatprep.mubr.msk.f32.mxu0 %vm2713_vm1, %v2714_v4  ;;  %2575 = vmatpush3.bf16.msra.mxu0 %v2574_v34 }
0x23bc   :  { %2576 = vmatprep.subr.bf16.mxu0 %v2712_v0 }
0x23bf   :  { %2578 = vmatpush3.bf16.msra.mxu0 %v2577_v49 }
0x248d   :  { %v1864_v15 = vpop.f32.mrb[26].mxu0 }
0x248e   :  { %v1868_v16 = vadd.f32 %v1864_v15, %v1175_v38  ;;  %v2442_v17 = vpop.f32.mrb[27].mxu0 }
0x2490   :  { %2696 = vtanh.f32 %v1868_v16  ;;  %v2130_v19 = vmul.f32 -1.442695, %v1868_v16 }
0x2492   :  { %2698 = vpow2.f32 %v2130_v19 }
0x249a   :  { %v2697_v18 = vpop.eup %2696 }
0x249b   :  { %1878 = vrot.lane.b32.xlu0 %v2697_v18, %s2715_s25 }
0x249c   :  { %v2699_v20 = vpop.eup %2698 }
0x249d   :  { %v1872_v21 = vadd.f32 1.0, %v2699_v20 }
0x249f   :  { %2700 = vrcp.f32 %v1872_v21 }
0x24a9   :  { %v2701_v22 = vpop.eup %2700 }
0x24aa   :  { %v1876_v4 = vmul.f32 %v2701_v22, %v1785_v39 }
0x250d   :  { %v1879_v23 = vpop.permute.xlu0 %1878 }
0x250e   :  { %v1881_v24 = vmul.f32 %v2701_v22, %v1879_v23 }
0x2510   :  { %1883 = vrot.lane.b32.xlu1 %v1881_v24, %s2715_s25 }
0x2582   :  { %v1884_v25 = vpop.permute.xlu1 %1883 }
0x2583   :  { %v1886_v58 = vadd.f32 %v1884_v25, %v1876_v4 }
0x2585   :  { %2702 = vtanh.f32 %v1886_v58 }
0x258f   :  { %v2703_v26 = vpop.eup %2702 }
0x2590   :  { %1889 = vrot.lane.b32.xlu0 %v2703_v26, %s2715_s25 }
0x2602   :  { %v1890_v27 = vpop.permute.xlu0 %1889 }
0x2603   :  { %v1892_v28 = vmul.f32 %v2701_v22, %v1890_v27 }
0x2605   :  { %1895 = vrot.lane.b32.xlu1 %v1892_v28, %s2716_s3 }
0x2677   :  { %v1896_v29 = vpop.permute.xlu1 %1895 }
0x2678   :  { %2452 = vmatmul.mubr.msk.f32.vlgmr.msra.gmra.mrb[18].mxu1 %vm192_vm2, %v1896_v29 }
0x274b   :  { %v1965_v31 = vpop.f32.mrb[18].mxu1 }
0x274c   :  { %v1969_v36 = vadd.f32 %v1965_v31, %v1180_v30  ;;  %v2453_v32 = vpop.f32.mrb[19].mxu1 }
0x274e   :  { %2704 = vtanh.f32 %v1969_v36  ;;  %v2132_v35 = vmul.f32 -1.442695, %v1969_v36 }
0x2750   :  { %2706 = vpow2.f32 %v2132_v35 }
0x2758   :  { %v2705_v33 = vpop.eup %2704 }
0x2759   :  { %1979 = vrot.lane.b32.xlu0 %v2705_v33, %s2715_s25 }
0x275a   :  { %v2707_v37 = vpop.eup %2706 }
0x275b   :  { %v1973_v41 = vadd.f32 1.0, %v2707_v37 }
0x275d   :  { %2708 = vrcp.f32 %v1973_v41 }
0x2767   :  { %v2709_v62 = vpop.eup %2708 }
0x2768   :  { %v1977_v44 = vmul.f32 %v2709_v62, %v1886_v58 }
0x27cb   :  { %v1980_v42 = vpop.permute.xlu0 %1979 }
0x27cc   :  { %v1982_v43 = vmul.f32 %v2709_v62, %v1980_v42 }
0x27ce   :  { %1984 = vrot.lane.b32.xlu1 %v1982_v43, %s2715_s25 }
0x2840   :  { %v1985_v45 = vpop.permute.xlu1 %1984 }
0x2841   :  { %v1987_v8 = vadd.f32 %v1985_v45, %v1977_v44 }
0x2843   :  { %2710 = vtanh.f32 %v1987_v8 }
0x284d   :  { %v2711_v50 = vpop.eup %2710 }
0x284e   :  { %1990 = vrot.lane.b32.xlu0 %v2711_v50, %s2715_s25 }
0x28c0   :  { %v1991_v51 = vpop.permute.xlu0 %1990 }
0x28c1   :  { %v1993_v40 = vmul.f32 %v2709_v62, %v1991_v51 }
0x28c3   :  { %2006 = vrot.lane.b32.xlu1 %v1993_v40, %s2716_s3 }
0x2935   :  { %v2007_v53 = vpop.permute.xlu1 %2006 }
0x2936   :  { %2463 = vmatmul.mubr.msk.f32.vlgmr.msra.gmra.mrb[28].mxu0 %vm192_vm2, %v2007_v53 }
0x2a09   :  { %v2076_v57 = vpop.f32.mrb[28].mxu0 }
0x2a0a   :  { %v2077_v60 = vadd.f32 %v2133_v54, %v2076_v57  ;;  %v2464_v63 = vpop.f32.mrb[29].mxu0 }
0x2a0c   :  { %2080 = vst [vmem:[%s3136_s9] sm:$0xff] %v2077_v60 }

</bundles_post_ra>
